<compile_context>
chip_gen: v7x
topology: tpu7x:2x2x1
jax: 0.10.0
libtpu: 0.0.40
codegen_flags: <defaults>
</compile_context>

<pallas_src>
import functools

import numpy as np
import jax
import jax.numpy as jnp
from jax.experimental import pallas as pl
from jax.experimental.pallas import tpu as pltpu


def _round_up(x, m):
    return ((x + m - 1) // m) * m


def _ntxent_kernel(a_ref, b_ref, out_ref, m_sc, l_sc, pos_sc, *,
                   n, s, tm, tn, inv_t):
    i = pl.program_id(0)          # row-tile index   ("parallel")
    j = pl.program_id(1)          # column-tile index (online-softmax reduction)

    @pl.when(j == 0)
    def _init():
        m_sc[...] = jnp.full_like(m_sc, -jnp.inf)
        l_sc[...] = jnp.zeros_like(l_sc)
        pos_sc[...] = jnp.zeros_like(pos_sc)

    a = a_ref[...].astype(jnp.float32)            # (tm, tn)  z[rows, cols]
    b = b_ref[...].astype(jnp.float32)            # (tn, tm)  z[cols, rows]
    sim = a * b.T * jnp.float32(inv_t)            # sim[r, c] = z[r,c]*z[c,r]/T

    row_g = i * tm + jax.lax.broadcasted_iota(jnp.int32, (tm, tn), 0)
    col_g = j * tn + jax.lax.broadcasted_iota(jnp.int32, (tm, tn), 1)
    col_valid = col_g < s                         # mask lane-padding columns

    # --- positive pair: partner column is row+n (row < n) or row-n (row >= n).
    # Only do the select + row-reduction in column tiles that can contain it.
    r0 = i * tm
    c0 = j * tn
    hit_hi = jnp.logical_and(c0 < r0 + tm + n, c0 + tn > r0 + n)
    hit_lo = jnp.logical_and(c0 < r0 + tm - n, c0 + tn > r0 - n)

    @pl.when(jnp.logical_or(hit_hi, hit_lo))
    def _pos():
        partner = jnp.logical_and(
            jnp.logical_or(col_g == row_g + n, col_g == row_g - n), col_valid)
        pos_sc[...] += jnp.sum(jnp.where(partner, sim, 0.0),
                               axis=1, keepdims=True)

    # --- online softmax over all columns j != i (diagonal & padding -> -inf)
    neg_inf = jnp.float32(-jnp.inf)
    masked = jnp.where(
        jnp.logical_or(row_g == col_g, jnp.logical_not(col_valid)),
        neg_inf, sim)
    tile_max = jnp.max(masked, axis=1, keepdims=True)        # (tm, 1)
    m_old = m_sc[...]
    m_new = jnp.maximum(m_old, tile_max)
    # The first column tile always holds >= 1 unmasked entry per row, so m_new
    # is finite and the rescale never hits (-inf) - (-inf); guard anyway.
    alpha = jnp.where(m_new == neg_inf, 0.0, jnp.exp(m_old - m_new))
    l_sc[...] = alpha * l_sc[...] + jnp.sum(jnp.exp(masked - m_new),
                                            axis=1, keepdims=True)
    m_sc[...] = m_new

    @pl.when(j == pl.num_programs(1) - 1)
    def _finalize():
        lse = m_sc[...] + jnp.log(l_sc[...])                  # (tm, 1)
        row_valid = (r0 + jax.lax.broadcasted_iota(jnp.int32, (tm, 1), 0)) < s
        out_ref[...] = jnp.where(row_valid, lse - pos_sc[...], 0.0)


def nt_xent_loss(z_i, z_j, temperature):
    n = z_i.shape[0]
    s = 2 * n
    assert z_i.shape == (n, s) and z_j.shape == (n, s), (
        "reference semantics require z = cat(z_i, z_j) to be square (2N, 2N)")

    # TODO(synk): feeding z_i / z_j separately (avoiding this S^2 copy) needs
    # per-half index_maps; accepted knowingly as a modest wrapper-side cost.
    z = jnp.concatenate([z_i, z_j], axis=0)       # (S, S)

    # Lane/sublane aligned padding and tile sizes (tn = lane dim, mult of 128).
    s_pad = _round_up(s, 128)
    tn = 512 if s_pad % 512 == 0 else (256 if s_pad % 256 == 0 else 128)
    tm = 256 if s_pad % 256 == 0 else 128
    if s_pad != s:
        z = jnp.pad(z, ((0, s_pad - s), (0, s_pad - s)))

    grid = (s_pad // tm, s_pad // tn)
    itemsize = int(jnp.dtype(z.dtype).itemsize)

    per_row = pl.pallas_call(
        functools.partial(_ntxent_kernel, n=n, s=s, tm=tm, tn=tn,
                          inv_t=1.0 / float(temperature)),
        out_shape=jax.ShapeDtypeStruct((s_pad, 1), jnp.float32),
        grid_spec=pltpu.PrefetchScalarGridSpec(
            num_scalar_prefetch=0,
            grid=grid,
            in_specs=[
                pl.BlockSpec((tm, tn), lambda i, j: (i, j)),   # z[row blk, col blk]
                pl.BlockSpec((tn, tm), lambda i, j: (j, i)),   # z[col blk, row blk]
            ],
            out_specs=pl.BlockSpec((tm, 1), lambda i, j: (i, 0)),
            scratch_shapes=[pltpu.VMEM((tm, 1), jnp.float32),   # running max
                            pltpu.VMEM((tm, 1), jnp.float32),   # running sum
                            pltpu.VMEM((tm, 1), jnp.float32)],  # positive sim
        ),
        compiler_params=pltpu.CompilerParams(
            dimension_semantics=("parallel", "arbitrary"),
            vmem_limit_bytes=32 * 1024 * 1024),
        cost_estimate=pl.CostEstimate(
            flops=8 * s_pad * s_pad,
            transcendentals=s_pad * s_pad,
            bytes_accessed=2 * s_pad * s_pad * itemsize + 4 * s_pad),
    )(z, z)

    return jnp.sum(per_row) / jnp.float32(s)


def _reference_loss_numpy(z_i, z_j, temperature):
    """Pure-numpy transcription of the PyTorch module's forward."""
    n = z_i.shape[0]
    z = np.concatenate([np.asarray(z_i), np.asarray(z_j)], axis=0).astype(np.float64)
    sim = z * z.T / temperature
    sim_i_j = np.diagonal(sim, offset=n)
    sim_j_i = np.diagonal(sim, offset=-n)
    pos = np.concatenate([sim_i_j, sim_j_i]).reshape(2 * n, 1)

    m = np.ones((n, n), dtype=bool)
    np.fill_diagonal(m, False)
    m2 = np.concatenate([m, m], axis=0)
    mask = np.concatenate([m2, m2], axis=1)
    neg = sim[mask].reshape(2 * n, -1)

    logits = np.concatenate([pos, neg], axis=1)  # (2N, 2N-1), label = 0
    mx = logits.max(axis=1, keepdims=True)
    lse = mx[:, 0] + np.log(np.exp(logits - mx).sum(axis=1))
    loss = np.sum(lse - logits[:, 0]) / (2 * n)
    return loss


if __name__ == "__main__":
    temperature = 0.5
    key = jax.random.PRNGKey(0)
    k1, k2, k3, k4 = jax.random.split(key, 4)

    # Case 1: lane-aligned size (N=64 -> 2N=128), no padding path.
    n1 = 64
    z_i1 = jax.random.normal(k1, (n1, 2 * n1), dtype=jnp.float32)
    z_j1 = jax.random.normal(k2, (n1, 2 * n1), dtype=jnp.float32)
    loss1 = jax.block_until_ready(nt_xent_loss(z_i1, z_j1, temperature))
    ref1 = _reference_loss_numpy(z_i1, z_j1, temperature)
    assert np.allclose(np.asarray(loss1), ref1, rtol=1e-4, atol=1e-4), (loss1, ref1)

    # Case 2: non-aligned size (N=10 -> 2N=20) to exercise padding/masking.
    n2 = 10
    z_i2 = jax.random.normal(k3, (n2, 2 * n2), dtype=jnp.float32)
    z_j2 = jax.random.normal(k4, (n2, 2 * n2), dtype=jnp.float32)
    loss2 = jax.block_until_ready(nt_xent_loss(z_i2, z_j2, temperature))
    ref2 = _reference_loss_numpy(z_i2, z_j2, temperature)
    assert np.allclose(np.asarray(loss2), ref2, rtol=1e-4, atol=1e-4), (loss2, ref2)

    print("KERNEL_OK")
</pallas_src>

<mosaic_0001>
module attributes {stable_mosaic.version = 11 : i64} {
  func.func @_ntxent_kernel(%arg0: i32, %arg1: i32, %arg2: memref<128x128xf32, #tpu.memory_space<vmem>>, %arg3: memref<128x128xf32, #tpu.memory_space<vmem>>, %arg4: memref<128x1xf32, #tpu.memory_space<vmem>>, %arg5: memref<128x1xf32, #tpu.memory_space<vmem>>, %arg6: memref<128x1xf32, #tpu.memory_space<vmem>>, %arg7: memref<128x1xf32, #tpu.memory_space<vmem>>) attributes {dimension_semantics = [#tpu.dimension_semantics<parallel>, #tpu.dimension_semantics<arbitrary>], iteration_bounds = array<i64: 1, 1>, scalar_prefetch = 0 : i64, scratch_operands = 3 : i64, tpu.core_type = #tpu.core_type<tc>, window_params = [{transform_indices = @transform_0, window_bounds = array<i64: 128, 128>}, {transform_indices = @transform_1, window_bounds = array<i64: 128, 128>}, {transform_indices = @transform_2, window_bounds = array<i64: 128, 1>}]} {
    %c0_i32 = arith.constant 0 : i32
    %0 = arith.cmpi eq, %arg1, %c0_i32 : i32
    %1 = arith.extui %0 : i1 to i32
    %c0_i32_0 = arith.constant 0 : i32
    %2 = arith.cmpi ne, %1, %c0_i32_0 : i32
    scf.if %2 {
      %cst_32 = arith.constant 0xFF800000 : f32
      %66 = vector.broadcast %cst_32 : f32 to vector<128x1xf32>
      %c0_33 = arith.constant 0 : index
      %c0_34 = arith.constant 0 : index
      %67 = vector.load %arg5[%c0_33, %c0_34] : memref<128x1xf32, #tpu.memory_space<vmem>>, vector<128x1xf32>
      tpu.vector_store %arg5[%c0_33, %c0_34], %66 {strides = array<i32>} : memref<128x1xf32, #tpu.memory_space<vmem>>, vector<128x1xf32>,
      %cst_35 = arith.constant 0.000000e+00 : f32
      %68 = vector.broadcast %cst_35 : f32 to vector<128x1xf32>
      %c0_36 = arith.constant 0 : index
      %c0_37 = arith.constant 0 : index
      %69 = vector.load %arg6[%c0_36, %c0_37] : memref<128x1xf32, #tpu.memory_space<vmem>>, vector<128x1xf32>
      tpu.vector_store %arg6[%c0_36, %c0_37], %68 {strides = array<i32>} : memref<128x1xf32, #tpu.memory_space<vmem>>, vector<128x1xf32>,
      %cst_38 = arith.constant 0.000000e+00 : f32
      %70 = vector.broadcast %cst_38 : f32 to vector<128x1xf32>
      %c0_39 = arith.constant 0 : index
      %c0_40 = arith.constant 0 : index
      %71 = vector.load %arg7[%c0_39, %c0_40] : memref<128x1xf32, #tpu.memory_space<vmem>>, vector<128x1xf32>
      tpu.vector_store %arg7[%c0_39, %c0_40], %70 {strides = array<i32>} : memref<128x1xf32, #tpu.memory_space<vmem>>, vector<128x1xf32>,
    } else {
    }
    %c0 = arith.constant 0 : index
    %c0_1 = arith.constant 0 : index
    %3 = vector.load %arg2[%c0, %c0_1] : memref<128x128xf32, #tpu.memory_space<vmem>>, vector<128x128xf32>
    %c0_2 = arith.constant 0 : index
    %c0_3 = arith.constant 0 : index
    %4 = vector.load %arg3[%c0_2, %c0_3] : memref<128x128xf32, #tpu.memory_space<vmem>>, vector<128x128xf32>
    %5 = tpu.transpose %4, [1, 0] : vector<128x128xf32> -> vector<128x128xf32>
    %6 = arith.mulf %3, %5 : vector<128x128xf32>
    %cst = arith.constant 2.000000e+00 : f32
    %7 = vector.broadcast %cst : f32 to vector<128x128xf32>
    %8 = arith.mulf %6, %7 : vector<128x128xf32>
    %c128_i32 = arith.constant 128 : i32
    %9 = arith.muli %arg0, %c128_i32 : i32
    %10 = tpu.iota {dimensions = array<i32: 0>} : vector<128x128xi32>
    %11 = vector.broadcast %9 : i32 to vector<128x128xi32>
    %12 = arith.addi %11, %10 : vector<128x128xi32>
    %c128_i32_4 = arith.constant 128 : i32
    %13 = arith.muli %arg1, %c128_i32_4 : i32
    %14 = tpu.iota {dimensions = array<i32: 1>} : vector<128x128xi32>
    %15 = vector.broadcast %13 : i32 to vector<128x128xi32>
    %16 = arith.addi %15, %14 : vector<128x128xi32>
    %c128_i32_5 = arith.constant 128 : i32
    %17 = vector.broadcast %c128_i32_5 : i32 to vector<128x128xi32>
    %18 = arith.cmpi slt, %16, %17 : vector<128x128xi32>
    %c128_i32_6 = arith.constant 128 : i32
    %19 = arith.muli %arg0, %c128_i32_6 : i32
    %c128_i32_7 = arith.constant 128 : i32
    %20 = arith.muli %arg1, %c128_i32_7 : i32
    %c128_i32_8 = arith.constant 128 : i32
    %21 = arith.addi %19, %c128_i32_8 : i32
    %c64_i32 = arith.constant 64 : i32
    %22 = arith.addi %21, %c64_i32 : i32
    %23 = arith.cmpi slt, %20, %22 : i32
    %c128_i32_9 = arith.constant 128 : i32
    %24 = arith.addi %20, %c128_i32_9 : i32
    %c64_i32_10 = arith.constant 64 : i32
    %25 = arith.addi %19, %c64_i32_10 : i32
    %26 = arith.cmpi sgt, %24, %25 : i32
    %27 = arith.andi %23, %26 : i1
    %c128_i32_11 = arith.constant 128 : i32
    %28 = arith.addi %19, %c128_i32_11 : i32
    %c64_i32_12 = arith.constant 64 : i32
    %29 = arith.subi %28, %c64_i32_12 : i32
    %30 = arith.cmpi slt, %20, %29 : i32
    %c128_i32_13 = arith.constant 128 : i32
    %31 = arith.addi %20, %c128_i32_13 : i32
    %c64_i32_14 = arith.constant 64 : i32
    %32 = arith.subi %19, %c64_i32_14 : i32
    %33 = arith.cmpi sgt, %31, %32 : i32
    %34 = arith.andi %30, %33 : i1
    %35 = arith.ori %27, %34 : i1
    %36 = arith.extui %35 : i1 to i32
    %c0_i32_15 = arith.constant 0 : i32
    %37 = arith.cmpi ne, %36, %c0_i32_15 : i32
    scf.if %37 {
      %c64_i32_32 = arith.constant 64 : i32
      %66 = vector.broadcast %c64_i32_32 : i32 to vector<128x128xi32>
      %67 = arith.addi %12, %66 : vector<128x128xi32>
      %68 = arith.cmpi eq, %16, %67 : vector<128x128xi32>
      %c64_i32_33 = arith.constant 64 : i32
      %69 = vector.broadcast %c64_i32_33 : i32 to vector<128x128xi32>
      %70 = arith.subi %12, %69 : vector<128x128xi32>
      %71 = arith.cmpi eq, %16, %70 : vector<128x128xi32>
      %72 = arith.ori %68, %71 : vector<128x128xi1>
      %73 = arith.andi %72, %18 : vector<128x128xi1>
      %c0_34 = arith.constant 0 : index
      %c0_35 = arith.constant 0 : index
      %74 = vector.load %arg7[%c0_34, %c0_35] : memref<128x1xf32, #tpu.memory_space<vmem>>, vector<128x1xf32>
      %cst_36 = arith.constant 0.000000e+00 : f32
      %75 = vector.broadcast %cst_36 : f32 to vector<128x128xf32>
      %76 = arith.select %73, %8, %75 : vector<128x128xi1>, vector<128x128xf32>
      %cst_37 = arith.constant dense<0.000000e+00> : vector<128xf32>
      %77 = vector.multi_reduction <add>, %76, %cst_37 [1] : vector<128x128xf32> to vector<128xf32>
      %78 = vector.shape_cast %77 : vector<128xf32> to vector<128x1xf32>
      %79 = arith.addf %74, %78 : vector<128x1xf32>
      %c0_38 = arith.constant 0 : index
      %c0_39 = arith.constant 0 : index
      %80 = vector.load %arg7[%c0_38, %c0_39] : memref<128x1xf32, #tpu.memory_space<vmem>>, vector<128x1xf32>
      tpu.vector_store %arg7[%c0_38, %c0_39], %79 {strides = array<i32>} : memref<128x1xf32, #tpu.memory_space<vmem>>, vector<128x1xf32>,
    } else {
    }
    %38 = arith.cmpi eq, %12, %16 : vector<128x128xi32>
    %cst_16 = arith.constant dense<true> : vector<128x128xi1>
    %39 = arith.xori %18, %cst_16 : vector<128x128xi1>
    %40 = arith.ori %38, %39 : vector<128x128xi1>
    %cst_17 = arith.constant 0xFF800000 : f32
    %41 = vector.broadcast %cst_17 : f32 to vector<128x128xf32>
    %42 = arith.select %40, %41, %8 : vector<128x128xi1>, vector<128x128xf32>
    %cst_18 = arith.constant dense<0xFF800000> : vector<128xf32>
    %43 = vector.multi_reduction <maximumf>, %42, %cst_18 [1] : vector<128x128xf32> to vector<128xf32>
    %44 = vector.shape_cast %43 : vector<128xf32> to vector<128x1xf32>
    %c0_19 = arith.constant 0 : index
    %c0_20 = arith.constant 0 : index
    %45 = vector.load %arg5[%c0_19, %c0_20] : memref<128x1xf32, #tpu.memory_space<vmem>>, vector<128x1xf32>
    %46 = arith.maximumf %45, %44 : vector<128x1xf32>
    %cst_21 = arith.constant 0xFF800000 : f32
    %47 = vector.broadcast %cst_21 : f32 to vector<128x1xf32>
    %48 = arith.cmpf oeq, %46, %47 : vector<128x1xf32>
    %49 = arith.subf %45, %46 : vector<128x1xf32>
    %50 = math.exp %49 : vector<128x1xf32>
    %cst_22 = arith.constant 0.000000e+00 : f32
    %51 = vector.broadcast %cst_22 : f32 to vector<128x1xf32>
    %52 = arith.select %48, %51, %50 : vector<128x1xi1>, vector<128x1xf32>
    %c0_23 = arith.constant 0 : index
    %c0_24 = arith.constant 0 : index
    %53 = vector.load %arg6[%c0_23, %c0_24] : memref<128x1xf32, #tpu.memory_space<vmem>>, vector<128x1xf32>
    %54 = arith.mulf %52, %53 : vector<128x1xf32>
    %55 = vector.broadcast %46 : vector<128x1xf32> to vector<128x128xf32>
    %56 = arith.subf %42, %55 : vector<128x128xf32>
    %57 = math.exp %56 : vector<128x128xf32>
    %cst_25 = arith.constant dense<0.000000e+00> : vector<128xf32>
    %58 = vector.multi_reduction <add>, %57, %cst_25 [1] : vector<128x128xf32> to vector<128xf32>
    %59 = vector.shape_cast %58 : vector<128xf32> to vector<128x1xf32>
    %60 = arith.addf %54, %59 : vector<128x1xf32>
    %c0_26 = arith.constant 0 : index
    %c0_27 = arith.constant 0 : index
    %61 = vector.load %arg6[%c0_26, %c0_27] : memref<128x1xf32, #tpu.memory_space<vmem>>, vector<128x1xf32>
    tpu.vector_store %arg6[%c0_26, %c0_27], %60 {strides = array<i32>} : memref<128x1xf32, #tpu.memory_space<vmem>>, vector<128x1xf32>,
    %c0_28 = arith.constant 0 : index
    %c0_29 = arith.constant 0 : index
    %62 = vector.load %arg5[%c0_28, %c0_29] : memref<128x1xf32, #tpu.memory_space<vmem>>, vector<128x1xf32>
    tpu.vector_store %arg5[%c0_28, %c0_29], %46 {strides = array<i32>} : memref<128x1xf32, #tpu.memory_space<vmem>>, vector<128x1xf32>,
    %c0_i32_30 = arith.constant 0 : i32
    %63 = arith.cmpi eq, %arg1, %c0_i32_30 : i32
    %64 = arith.extui %63 : i1 to i32
    %c0_i32_31 = arith.constant 0 : i32
    %65 = arith.cmpi ne, %64, %c0_i32_31 : i32
    scf.if %65 {
      %c0_32 = arith.constant 0 : index
      %c0_33 = arith.constant 0 : index
      %66 = vector.load %arg5[%c0_32, %c0_33] : memref<128x1xf32, #tpu.memory_space<vmem>>, vector<128x1xf32>
      %c0_34 = arith.constant 0 : index
      %c0_35 = arith.constant 0 : index
      %67 = vector.load %arg6[%c0_34, %c0_35] : memref<128x1xf32, #tpu.memory_space<vmem>>, vector<128x1xf32>
      %68 = math.log %67 : vector<128x1xf32>
      %69 = arith.addf %66, %68 : vector<128x1xf32>
      %70 = tpu.iota {dimensions = array<i32: 0>} : vector<128x1xi32>
      %71 = vector.broadcast %19 : i32 to vector<128x1xi32>
      %72 = arith.addi %71, %70 : vector<128x1xi32>
      %c128_i32_36 = arith.constant 128 : i32
      %73 = vector.broadcast %c128_i32_36 : i32 to vector<128x1xi32>
      %74 = arith.cmpi slt, %72, %73 : vector<128x1xi32>
      %c0_37 = arith.constant 0 : index
      %c0_38 = arith.constant 0 : index
      %75 = vector.load %arg7[%c0_37, %c0_38] : memref<128x1xf32, #tpu.memory_space<vmem>>, vector<128x1xf32>
      %76 = arith.subf %69, %75 : vector<128x1xf32>
      %cst_39 = arith.constant 0.000000e+00 : f32
      %77 = vector.broadcast %cst_39 : f32 to vector<128x1xf32>
      %78 = arith.select %74, %76, %77 : vector<128x1xi1>, vector<128x1xf32>
      %c0_40 = arith.constant 0 : index
      %c0_41 = arith.constant 0 : index
      %79 = vector.load %arg4[%c0_40, %c0_41] : memref<128x1xf32, #tpu.memory_space<vmem>>, vector<128x1xf32>
      tpu.vector_store %arg4[%c0_40, %c0_41], %78 {strides = array<i32>} : memref<128x1xf32, #tpu.memory_space<vmem>>, vector<128x1xf32>,
    } else {
    }
    return
  }
  func.func @transform_0(%arg0: i32, %arg1: i32) -> (i32, i32) {
    %c0_i32 = arith.constant 0 : i32
    return %arg0, %arg1 : i32, i32
  }
  func.func @transform_1(%arg0: i32, %arg1: i32) -> (i32, i32) {
    %c0_i32 = arith.constant 0 : i32
    return %arg1, %arg0 : i32, i32
  }
  func.func @transform_2(%arg0: i32, %arg1: i32) -> (i32, i32) {
    %c0_i32 = arith.constant 0 : i32
    %c0_i32_0 = arith.constant 0 : i32
    return %arg0, %c0_i32 : i32, i32
  }
}

</mosaic_0001>

<bundles_post_ra>
// kernel: tpu_custom_call.1
= control target key start
LH: loop header
LB: loop body
LE: loop exit
PB: predicated region body
PF: predicated region fallthrough
CT: control target
= control target key end

     0   :  { %7 = vsyncpa [#allocation6], 0  ;;  %s1785_s0 = inlined_call_operand.hbm [shape: f32[128,128], index: 0, kind: input, shape index: {}]   ;;  %s1786_s1 = inlined_call_operand.hbm [shape: f32[128,128], index: 1, kind: input, shape index: {}]   ;;  %s1787_s2 = inlined_call_operand.vmem [shape: f32[128,1], index: 2, kind: output, shape index: {}]  }
   0x1   :  { %8 = vsyncpa [#allocation8], 0  ;;  %s1210_s9 = smov [#allocation5]   ;;  %s1162_s13 = scalar_lea.hbm %s1785_s0, 2048 }
   0x2   :  { %s14_s10 = sshll.u32 %s1210_s9, 4  ;;  %p1163_p0 = scmp.ne.s32.totalorder %s1785_s0, %s1162_s13  ;;  %s15_s10 = int_to_ptr.vmem [resolvable:$true] %s14_s10 }
   0x3   :  { %p1166_p1 = scmp.lt.u32.totalorder %s1162_s13, %s1785_s0 }
   0x5   :  { %p1168_p2 = pnand %p1166_p1, %p1163_p0 }
   0x7   :  { %1171 = shalt.err (!%p1168_p2)
}
   0x8   :  { %s1172_s18 = scalar_lea.vmem %s15_s10, 2048  ;;  %p1177_p4 = scmp.lt.s32.totalorder %s15_s10, %s15_s10 }
   0x9   :  { %p1173_p3 = scmp.ne.s32.totalorder %s15_s10, %s1172_s18  ;;  %p1178_p5 = scmp.lt.s32.totalorder %s1172_s18, %s1172_s18 }
   0xb   :  { %p1179_p6 = por %p1178_p5, %p1177_p4 }
   0xd   :  { %p1180_p7 = pnand %p1179_p6, %p1173_p3 }
   0xf   :  { %1183 = shalt.err (!%p1180_p7)
}
  0x10   :  { %s1211_s19 = smov 128   ;;  %s1212_s20 = smov 8  }
  0x11   :  { %20 = dma.hbm_to_vmem [thread:$0]  %s1785_s0, 2048, %s15_s10, [#allocation6], %s1211_s19, %s1211_s19, %s1212_s20  }
  0x12   :  { %s1213_s23 = smov [#allocation7]   ;;  %s1184_s27 = scalar_lea.hbm %s1786_s1, 2048 }
  0x13   :  { %s26_s24 = sshll.u32 %s1213_s23, 4  ;;  %p1185_p8 = scmp.ne.s32.totalorder %s1786_s1, %s1184_s27  ;;  %s27_s24 = int_to_ptr.vmem [resolvable:$true] %s26_s24 }
  0x14   :  { %p1188_p9 = scmp.lt.u32.totalorder %s1184_s27, %s1786_s1 }
  0x16   :  { %p1190_p10 = pnand %p1188_p9, %p1185_p8 }
  0x18   :  { %1193 = shalt.err (!%p1190_p10)
}
  0x19   :  { %s1194_s4 = scalar_lea.vmem %s27_s24, 2048  ;;  %p1199_p12 = scmp.lt.s32.totalorder %s27_s24, %s27_s24 }
  0x1a   :  { %p1195_p11 = scmp.ne.s32.totalorder %s27_s24, %s1194_s4  ;;  %p1200_p13 = scmp.lt.s32.totalorder %s1194_s4, %s1194_s4 }
  0x1c   :  { %p1201_p0 = por %p1200_p13, %p1199_p12 }
  0x1e   :  { %p1202_p1 = pnand %p1201_p0, %p1195_p11 }
  0x20   :  { %1205 = shalt.err (!%p1202_p1)
}
  0x21   :  { %32 = dma.hbm_to_vmem [thread:$0]  %s1786_s1, 2048, %s27_s24, [#allocation8], %s1211_s19, %s1211_s19, %s1212_s20  }
  0x22   :  { %1206 = dma.done.wait [#allocation6], 2048  }
  0x23   :  { %1207 = vsyncadd [#allocation6], 4294965248 }
  0x24   :  { %1208 = dma.done.wait [#allocation8], 2048  }
  0x25   :  { %1209 = vsyncadd [#allocation8], 4294965248  ;;  %v189_v0 = vlaneseq  ;;  %v108_v1 = vld [vmem:[#allocation7] sm:$0xff]  ;;  %v109_v3 = vld [vmem:[#allocation7 + $0x8] sm:$0xff]  ;;  %vm43_vm12 = vcmask 7168   ;;  %v1214_v49 = vmov -inf  }
  0x26   :  { %124 = vxpose.xlu0.b32.start [1/16] %v108_v1, 128  ;;  %v110_v7 = vld [vmem:[#allocation7 + $0x10] sm:$0xff]  ;;  %v111_v10 = vld [vmem:[#allocation7 + $0x18] sm:$0xff]  ;;  %v112_v13 = vld [vmem:[#allocation7 + $0x20] sm:$0xff]  ;;  %44 = vst.msk [vmem:[#allocation2] sm:$0xff] %vm43_vm12, %v1214_v49 }
  0x27   :  { %v1256_v2 = vshrl.u32 %v189_v0, 7  ;;  %v1258_v4 = vand.u32 127, %v189_v0  ;;  %v113_v16 = vld [vmem:[#allocation7 + $0x28] sm:$0xff]  ;;  %v114_v19 = vld [vmem:[#allocation7 + $0x30] sm:$0xff]  ;;  %v115_v22 = vld [vmem:[#allocation7 + $0x38] sm:$0xff]  ;;  %45 = vst.msk [vmem:[#allocation2 + $0x8] sm:$0xff] %vm43_vm12, %v1214_v49 }
  0x28   :  { %v116_v25 = vld [vmem:[#allocation7 + $0x40] sm:$0xff]  ;;  %v117_v27 = vld [vmem:[#allocation7 + $0x48] sm:$0xff]  ;;  %v118_v30 = vld [vmem:[#allocation7 + $0x50] sm:$0xff]  ;;  %46 = vst.msk [vmem:[#allocation2 + $0x10] sm:$0xff] %vm43_vm12, %v1214_v49 }
  0x29   :  { %v1261_v5 = vadd.s32 64, %v1256_v2  ;;  %v1264_v6 = vadd.s32 8, %v1256_v2  ;;  %v1272_v9 = vadd.s32 16, %v1256_v2  ;;  %v1280_v12 = vadd.s32 24, %v1256_v2  ;;  %v119_v33 = vld [vmem:[#allocation7 + $0x58] sm:$0xff]  ;;  %v120_v36 = vld [vmem:[#allocation7 + $0x60] sm:$0xff] }
  0x2a   :  { %125 = vxpose.xlu0.b32.cont [2/16] %v109_v3, 128  ;;  %v1288_v15 = vadd.s32 32, %v1256_v2  ;;  %v1296_v18 = vadd.s32 40, %v1256_v2  ;;  %v1304_v21 = vadd.s32 48, %v1256_v2  ;;  %v1312_v24 = vadd.s32 56, %v1256_v2  ;;  %v121_v39 = vld [vmem:[#allocation7 + $0x68] sm:$0xff]  ;;  %v122_v42 = vld [vmem:[#allocation7 + $0x70] sm:$0xff] }
  0x2b   :  { %vm261_vm0 = vcmp.eq.s32.totalorder %v1258_v4, %v1261_v5  ;;  %v1269_v8 = vadd.s32 64, %v1264_v6  ;;  %v1277_v11 = vadd.s32 64, %v1272_v9  ;;  %v1285_v14 = vadd.s32 64, %v1280_v12  ;;  %v123_v45 = vld [vmem:[#allocation7 + $0x78] sm:$0xff]  ;;  %47 = vst.msk [vmem:[#allocation2 + $0x18] sm:$0xff] %vm43_vm12, %v1214_v49  ;;  %48 = vst.msk [vmem:[#allocation2 + $0x20] sm:$0xff] %vm43_vm12, %v1214_v49 }
  0x2c   :  { %v1293_v17 = vadd.s32 64, %v1288_v15  ;;  %v1301_v20 = vadd.s32 64, %v1296_v18  ;;  %v1309_v23 = vadd.s32 64, %v1304_v21  ;;  %v1317_v26 = vadd.s32 64, %v1312_v24  ;;  %49 = vst.msk [vmem:[#allocation2 + $0x28] sm:$0xff] %vm43_vm12, %v1214_v49  ;;  %50 = vst.msk [vmem:[#allocation2 + $0x30] sm:$0xff] %vm43_vm12, %v1214_v49 }
  0x2d   :  { %vm262_vm1 = vcmp.eq.s32.totalorder %v1258_v4, %v1269_v8  ;;  %vm263_vm2 = vcmp.eq.s32.totalorder %v1258_v4, %v1277_v11  ;;  %vm264_vm3 = vcmp.eq.s32.totalorder %v1258_v4, %v1285_v14  ;;  %v1322_v28 = vadd.s32 4294967232, %v1261_v5  ;;  %51 = vst.msk [vmem:[#allocation2 + $0x38] sm:$0xff] %vm43_vm12, %v1214_v49  ;;  %52 = vst.msk [vmem:[#allocation2 + $0x40] sm:$0xff] %vm43_vm12, %v1214_v49  ;;  %v92_v50 = vld [vmem:[#allocation5] sm:$0xff]  ;;  %v93_v53 = vld [vmem:[#allocation5 + $0x8] sm:$0xff] }
  0x2e   :  { %126 = vxpose.xlu0.b32.cont [3/16] %v110_v7, 128  ;;  %vm265_vm4 = vcmp.eq.s32.totalorder %v1258_v4, %v1293_v17  ;;  %vm266_vm5 = vcmp.eq.s32.totalorder %v1258_v4, %v1301_v20  ;;  %vm267_vm6 = vcmp.eq.s32.totalorder %v1258_v4, %v1309_v23  ;;  %vm268_vm7 = vcmp.eq.s32.totalorder %v1258_v4, %v1317_v26  ;;  %v94_v59 = vld [vmem:[#allocation5 + $0x10] sm:$0xff]  ;;  %v95_v1 = vld [vmem:[#allocation5 + $0x18] sm:$0xff]  ;;  %v96_v8 = vld [vmem:[#allocation5 + $0x20] sm:$0xff] }
  0x2f   :  { %v1325_v29 = vadd.s32 72, %v1256_v2  ;;  %vm301_vm8 = vcmp.eq.s32.totalorder %v1258_v4, %v1322_v28  ;;  %v1333_v32 = vadd.s32 80, %v1256_v2  ;;  %v1341_v35 = vadd.s32 88, %v1256_v2  ;;  %53 = vst.msk [vmem:[#allocation2 + $0x48] sm:$0xff] %vm43_vm12, %v1214_v49  ;;  %54 = vst.msk [vmem:[#allocation2 + $0x50] sm:$0xff] %vm43_vm12, %v1214_v49  ;;  %v97_v11 = vld [vmem:[#allocation5 + $0x28] sm:$0xff] }
  0x30   :  { %v1349_v38 = vadd.s32 96, %v1256_v2  ;;  %v1357_v41 = vadd.s32 104, %v1256_v2  ;;  %v1365_v44 = vadd.s32 112, %v1256_v2  ;;  %v1373_v47 = vadd.s32 120, %v1256_v2  ;;  %55 = vst.msk [vmem:[#allocation2 + $0x58] sm:$0xff] %vm43_vm12, %v1214_v49  ;;  %56 = vst.msk [vmem:[#allocation2 + $0x60] sm:$0xff] %vm43_vm12, %v1214_v49 }
  0x31   :  { %v1330_v31 = vadd.s32 4294967232, %v1325_v29  ;;  %v1338_v34 = vadd.s32 4294967232, %v1333_v32  ;;  %v1346_v37 = vadd.s32 4294967232, %v1341_v35  ;;  %57 = vst.msk [vmem:[#allocation2 + $0x68] sm:$0xff] %vm43_vm12, %v1214_v49  ;;  %58 = vst.msk [vmem:[#allocation2 + $0x70] sm:$0xff] %vm43_vm12, %v1214_v49  ;;  %vm438_vm15 = vcmp.eq.s32.totalorder %v1256_v2, %v1258_v4  ;;  %v99_v17 = vld [vmem:[#allocation5 + $0x38] sm:$0xff] }
  0x32   :  { %127 = vxpose.xlu0.b32.cont [4/16] %v111_v10, 128  ;;  %v1354_v40 = vadd.s32 4294967232, %v1349_v38  ;;  %v1362_v43 = vadd.s32 4294967232, %v1357_v41  ;;  %v1370_v46 = vadd.s32 4294967232, %v1365_v44  ;;  %v1378_v48 = vadd.s32 4294967232, %v1373_v47  ;;  %59 = vst.msk [vmem:[#allocation2 + $0x78] sm:$0xff] %vm43_vm12, %v1214_v49  ;;  %v100_v20 = vld [vmem:[#allocation5 + $0x40] sm:$0xff] }
  0x33   :  { %vm302_vm9 = vcmp.eq.s32.totalorder %v1258_v4, %v1330_v31  ;;  %vm303_vm10 = vcmp.eq.s32.totalorder %v1258_v4, %v1338_v34  ;;  %vm304_vm11 = vcmp.eq.s32.totalorder %v1258_v4, %v1346_v37  ;;  %vm439_vm14 = vcmp.eq.s32.totalorder %v1264_v6, %v1258_v4  ;;  %v102_v26 = vld [vmem:[#allocation5 + $0x50] sm:$0xff]  ;;  %v103_v28 = vld [vmem:[#allocation5 + $0x58] sm:$0xff]  ;;  %v104_v31 = vld [vmem:[#allocation5 + $0x60] sm:$0xff] }
  0x34   :  { %vm306_vm13 = vcmp.eq.s32.totalorder %v1258_v4, %v1362_v43  ;;  %v105_v34 = vld [vmem:[#allocation5 + $0x68] sm:$0xff]  ;;  %v106_v37 = vld [vmem:[#allocation5 + $0x70] sm:$0xff] }
  0x36   :  { %128 = vxpose.xlu0.b32.cont [5/16] %v112_v13, 128 }
  0x3a   :  { %129 = vxpose.xlu0.b32.cont [6/16] %v113_v16, 128 }
  0x3e   :  { %130 = vxpose.xlu0.b32.cont [7/16] %v114_v19, 128 }
  0x42   :  { %131 = vxpose.xlu0.b32.cont [8/16] %v115_v22, 128 }
  0x46   :  { %132 = vxpose.xlu0.b32.cont [9/16] %v116_v25, 128 }
  0x4a   :  { %133 = vxpose.xlu0.b32.cont [10/16] %v117_v27, 128 }
  0x4e   :  { %134 = vxpose.xlu0.b32.cont [11/16] %v118_v30, 128 }
  0x52   :  { %135 = vxpose.xlu0.b32.cont [12/16] %v119_v33, 128  ;;  %v1215_v33 = vmov 0  }
  0x53   :  { %1065 = vset.pattern.permute.xlu1 %v1215_v33 }
  0x56   :  { %136 = vxpose.xlu0.b32.cont [13/16] %v120_v36, 128  ;;  %v98_v36 = vld [vmem:[#allocation5 + $0x30] sm:$0xff] }
  0x5a   :  { %137 = vxpose.xlu0.b32.cont [14/16] %v121_v39, 128 }
  0x5e   :  { %138 = vxpose.xlu0.b32.cont [15/16] %v122_v42, 128 }
  0x62   :  { %139 = vxpose.xlu0.b32.end [16/16] %v123_v45, 128 }
  0x8b   :  { %1064 = vset.pattern.permute.xlu0 %v1215_v33 }
  0xa6   :  { %v140_v51 = vpop.trf.xlu0 }
  0xa7   :  { %v156_v52 = vmul.f32 %v140_v51, %v92_v50 }
  0xa9   :  { %v172_v54 = vmul.f32 2.0, %v156_v52 }
  0xaa   :  { %v141_v55 = vpop.trf.xlu0 }
  0xab   :  { %v157_v56 = vmul.f32 %v141_v55, %v93_v53  ;;  %v1400_v57 = vsel %vm438_vm15, -inf, %v172_v54  ;;  %v1405_v58 = vsel %vm261_vm0, %v172_v54, 0.0  ;;  %vm440_vm0 = vcmp.eq.s32.totalorder %v1272_v9, %v1258_v4 }
  0xac   :  { %487 = vmax.xlane.f32.xlu1 %v1400_v57  ;;  %v1216_v54 = vmov 0.0   ;;  %vm452_vm15 = vcmp.eq.s32.totalorder %v1365_v44, %v1258_v4 }
  0xad   :  { %v173_v60 = vmul.f32 2.0, %v157_v56  ;;  %77 = vst.msk [vmem:[#allocation4 + $0x8] sm:$0xff] %vm43_vm12, %v1216_v54  ;;  %60 = vst.msk [vmem:[#allocation3] sm:$0xff] %vm43_vm12, %v1216_v54 }
  0xae   :  { %v142_v61 = vpop.trf.xlu0  ;;  %61 = vst.msk [vmem:[#allocation3 + $0x8] sm:$0xff] %vm43_vm12, %v1216_v54  ;;  %62 = vst.msk [vmem:[#allocation3 + $0x10] sm:$0xff] %vm43_vm12, %v1216_v54 }
  0xaf   :  { %v158_v62 = vmul.f32 %v142_v61, %v94_v59  ;;  %v1410_v63 = vsel %vm439_vm14, -inf, %v173_v60  ;;  %v1415_v0 = vsel %vm262_vm1, %v173_v60, 0.0  ;;  %vm441_vm1 = vcmp.eq.s32.totalorder %v1280_v12, %v1258_v4  ;;  %63 = vst.msk [vmem:[#allocation3 + $0x18] sm:$0xff] %vm43_vm12, %v1216_v54  ;;  %64 = vst.msk [vmem:[#allocation3 + $0x20] sm:$0xff] %vm43_vm12, %v1216_v54  ;;  %v101_v60 = vld [vmem:[#allocation5 + $0x48] sm:$0xff] }
  0xb0   :  { %489 = vmax.xlane.f32.xlu1 %v1410_v63  ;;  %65 = vst.msk [vmem:[#allocation3 + $0x28] sm:$0xff] %vm43_vm12, %v1216_v54  ;;  %66 = vst.msk [vmem:[#allocation3 + $0x30] sm:$0xff] %vm43_vm12, %v1216_v54  ;;  %vm1788_vm14 = vcmp.eq.s32.totalorder %v1258_v4, %v1354_v40  ;;  %v107_v40 = vld [vmem:[#allocation5 + $0x78] sm:$0xff] }
  0xb1   :  { %v174_v2 = vmul.f32 2.0, %v158_v62  ;;  %67 = vst.msk [vmem:[#allocation3 + $0x38] sm:$0xff] %vm43_vm12, %v1216_v54  ;;  %68 = vst.msk [vmem:[#allocation3 + $0x40] sm:$0xff] %vm43_vm12, %v1216_v54 }
  0xb2   :  { %v143_v3 = vpop.trf.xlu0  ;;  %69 = vst.msk [vmem:[#allocation3 + $0x48] sm:$0xff] %vm43_vm12, %v1216_v54  ;;  %70 = vst.msk [vmem:[#allocation3 + $0x50] sm:$0xff] %vm43_vm12, %v1216_v54 }
  0xb3   :  { %v159_v7 = vmul.f32 %v143_v3, %v95_v1  ;;  %v1420_v6 = vsel %vm440_vm0, -inf, %v174_v2  ;;  %v1425_v10 = vsel %vm263_vm2, %v174_v2, 0.0  ;;  %vm442_vm2 = vcmp.eq.s32.totalorder %v1288_v15, %v1258_v4  ;;  %71 = vst.msk [vmem:[#allocation3 + $0x58] sm:$0xff] %vm43_vm12, %v1216_v54  ;;  %72 = vst.msk [vmem:[#allocation3 + $0x60] sm:$0xff] %vm43_vm12, %v1216_v54 }
  0xb4   :  { %491 = vmax.xlane.f32.xlu1 %v1420_v6  ;;  %73 = vst.msk [vmem:[#allocation3 + $0x68] sm:$0xff] %vm43_vm12, %v1216_v54  ;;  %74 = vst.msk [vmem:[#allocation3 + $0x70] sm:$0xff] %vm43_vm12, %v1216_v54  ;;  %vm1789_vm0 = vcmp.eq.s32.totalorder %v1258_v4, %v1370_v46 }
  0xb5   :  { %v175_v13 = vmul.f32 2.0, %v159_v7  ;;  %75 = vst.msk [vmem:[#allocation3 + $0x78] sm:$0xff] %vm43_vm12, %v1216_v54  ;;  %76 = vst.msk [vmem:[#allocation4] sm:$0xff] %vm43_vm12, %v1216_v54 }
  0xb6   :  { %v144_v16 = vpop.trf.xlu0  ;;  %78 = vst.msk [vmem:[#allocation4 + $0x10] sm:$0xff] %vm43_vm12, %v1216_v54  ;;  %79 = vst.msk [vmem:[#allocation4 + $0x18] sm:$0xff] %vm43_vm12, %v1216_v54 }
  0xb7   :  { %v160_v19 = vmul.f32 %v144_v16, %v96_v8  ;;  %v1430_v9 = vsel %vm441_vm1, -inf, %v175_v13  ;;  %v1435_v22 = vsel %vm264_vm3, %v175_v13, 0.0  ;;  %vm443_vm3 = vcmp.eq.s32.totalorder %v1296_v18, %v1258_v4  ;;  %80 = vst.msk [vmem:[#allocation4 + $0x20] sm:$0xff] %vm43_vm12, %v1216_v54  ;;  %81 = vst.msk [vmem:[#allocation4 + $0x28] sm:$0xff] %vm43_vm12, %v1216_v54 }
  0xb8   :  { %493 = vmax.xlane.f32.xlu1 %v1430_v9  ;;  %82 = vst.msk [vmem:[#allocation4 + $0x30] sm:$0xff] %vm43_vm12, %v1216_v54  ;;  %83 = vst.msk [vmem:[#allocation4 + $0x38] sm:$0xff] %vm43_vm12, %v1216_v54  ;;  %vm1790_vm1 = vcmp.eq.s32.totalorder %v1258_v4, %v1378_v48 }
  0xb9   :  { %v176_v25 = vmul.f32 2.0, %v160_v19  ;;  %84 = vst.msk [vmem:[#allocation4 + $0x40] sm:$0xff] %vm43_vm12, %v1216_v54  ;;  %85 = vst.msk [vmem:[#allocation4 + $0x48] sm:$0xff] %vm43_vm12, %v1216_v54 }
  0xba   :  { %v145_v27 = vpop.trf.xlu0  ;;  %86 = vst.msk [vmem:[#allocation4 + $0x50] sm:$0xff] %vm43_vm12, %v1216_v54  ;;  %87 = vst.msk [vmem:[#allocation4 + $0x58] sm:$0xff] %vm43_vm12, %v1216_v54 }
  0xbb   :  { %v161_v30 = vmul.f32 %v145_v27, %v97_v11  ;;  %v1440_v12 = vsel %vm442_vm2, -inf, %v176_v25  ;;  %v1445_v14 = vsel %vm265_vm4, %v176_v25, 0.0  ;;  %vm444_vm4 = vcmp.eq.s32.totalorder %v1304_v21, %v1258_v4  ;;  %88 = vst.msk [vmem:[#allocation4 + $0x60] sm:$0xff] %vm43_vm12, %v1216_v54  ;;  %89 = vst.msk [vmem:[#allocation4 + $0x68] sm:$0xff] %vm43_vm12, %v1216_v54 }
  0xbc   :  { %495 = vmax.xlane.f32.xlu1 %v1440_v12  ;;  %90 = vst.msk [vmem:[#allocation4 + $0x70] sm:$0xff] %vm43_vm12, %v1216_v54  ;;  %91 = vst.msk [vmem:[#allocation4 + $0x78] sm:$0xff] %vm43_vm12, %v1216_v54 }
  0xbd   :  { %v177_v15 = vmul.f32 2.0, %v161_v30 }
  0xbe   :  { %v146_v39 = vpop.trf.xlu0 }
  0xbf   :  { %v162_v42 = vmul.f32 %v146_v39, %v98_v36  ;;  %v1450_v45 = vsel %vm443_vm3, -inf, %v177_v15  ;;  %v1455_v49 = vsel %vm266_vm5, %v177_v15, 0.0  ;;  %vm445_vm5 = vcmp.eq.s32.totalorder %v1312_v24, %v1258_v4 }
  0xc0   :  { %497 = vmax.xlane.f32.xlu1 %v1450_v45 }
  0xc1   :  { %v178_v50 = vmul.f32 2.0, %v162_v42 }
  0xc2   :  { %v147_v51 = vpop.trf.xlu0 }
  0xc3   :  { %v163_v52 = vmul.f32 %v147_v51, %v99_v17  ;;  %v1460_v18 = vsel %vm444_vm4, -inf, %v178_v50  ;;  %v1465_v53 = vsel %vm267_vm6, %v178_v50, 0.0  ;;  %vm446_vm6 = vcmp.eq.s32.totalorder %v1261_v5, %v1258_v4 }
  0xc4   :  { %499 = vmax.xlane.f32.xlu1 %v1460_v18 }
  0xc5   :  { %v179_v21 = vmul.f32 2.0, %v163_v52 }
  0xc6   :  { %v148_v23 = vpop.trf.xlu0 }
  0xc7   :  { %v164_v55 = vmul.f32 %v148_v23, %v100_v20  ;;  %v1505_v56 = vsel %vm445_vm5, -inf, %v179_v21  ;;  %v1510_v59 = vsel %vm268_vm7, %v179_v21, 0.0  ;;  %vm447_vm7 = vcmp.eq.s32.totalorder %v1325_v29, %v1258_v4 }
  0xc8   :  { %501 = vmax.xlane.f32.xlu1 %v1505_v56 }
  0xc9   :  { %v180_v61 = vmul.f32 2.0, %v164_v55 }
  0xca   :  { %v149_v62 = vpop.trf.xlu0 }
  0xcb   :  { %v165_v1 = vmul.f32 %v149_v62, %v101_v60  ;;  %v1515_v2 = vsel %vm446_vm6, -inf, %v180_v61  ;;  %v1520_v24 = vsel %vm301_vm8, %v180_v61, 0.0  ;;  %vm448_vm8 = vcmp.eq.s32.totalorder %v1333_v32, %v1258_v4  ;;  %v519_v61 = vld [vmem:[#allocation2] sm:$0xff] }
  0xcc   :  { %503 = vmax.xlane.f32.xlu1 %v1515_v2 }
  0xcd   :  { %v181_v3 = vmul.f32 2.0, %v165_v1  ;;  %v520_v1 = vld [vmem:[#allocation2 + $0x8] sm:$0xff] }
  0xce   :  { %v150_v7 = vpop.trf.xlu0 }
  0xcf   :  { %v166_v8 = vmul.f32 %v150_v7, %v102_v26  ;;  %v1525_v5 = vsel %vm447_vm7, -inf, %v181_v3  ;;  %v1530_v13 = vsel %vm302_vm9, %v181_v3, 0.0  ;;  %vm449_vm9 = vcmp.eq.s32.totalorder %v1341_v35, %v1258_v4 }
  0xd0   :  { %505 = vmax.xlane.f32.xlu1 %v1525_v5 }
  0xd1   :  { %v182_v16 = vmul.f32 2.0, %v166_v8  ;;  %v521_v8 = vld [vmem:[#allocation2 + $0x10] sm:$0xff] }
  0xd2   :  { %v151_v19 = vpop.trf.xlu0 }
  0xd3   :  { %v167_v11 = vmul.f32 %v151_v19, %v103_v28  ;;  %v1535_v29 = vsel %vm448_vm8, -inf, %v182_v16  ;;  %v1540_v25 = vsel %vm303_vm10, %v182_v16, 0.0  ;;  %vm450_vm10 = vcmp.eq.s32.totalorder %v1349_v38, %v1258_v4  ;;  %v522_v19 = vld [vmem:[#allocation2 + $0x18] sm:$0xff] }
  0xd4   :  { %507 = vmax.xlane.f32.xlu1 %v1535_v29 }
  0xd5   :  { %v183_v27 = vmul.f32 2.0, %v167_v11 }
  0xd6   :  { %v152_v30 = vpop.trf.xlu0 }
  0xd7   :  { %v168_v33 = vmul.f32 %v152_v30, %v104_v31  ;;  %v1545_v32 = vsel %vm449_vm9, -inf, %v183_v27  ;;  %v1550_v36 = vsel %vm304_vm11, %v183_v27, 0.0  ;;  %vm451_vm11 = vcmp.eq.s32.totalorder %v1357_v41, %v1258_v4 }
  0xd8   :  { %509 = vmax.xlane.f32.xlu1 %v1545_v32 }
  0xd9   :  { %v184_v15 = vmul.f32 2.0, %v168_v33  ;;  %v523_v33 = vld [vmem:[#allocation2 + $0x20] sm:$0xff] }
  0xda   :  { %v153_v39 = vpop.trf.xlu0 }
  0xdb   :  { %v169_v42 = vmul.f32 %v153_v39, %v105_v34  ;;  %v1555_v35 = vsel %vm450_vm10, -inf, %v184_v15  ;;  %v1560_v17 = vsel %vm1788_vm14, %v184_v15, 0.0 }
  0xdc   :  { %511 = vmax.xlane.f32.xlu1 %v1555_v35 }
  0xdd   :  { %v185_v50 = vmul.f32 2.0, %v169_v42 }
  0xde   :  { %v154_v51 = vpop.trf.xlu0 }
  0xdf   :  { %v170_v52 = vmul.f32 %v154_v51, %v106_v37  ;;  %v1565_v38 = vsel %vm451_vm11, -inf, %v185_v50  ;;  %v1570_v20 = vsel %vm306_vm13, %v185_v50, 0.0  ;;  %vm453_vm13 = vcmp.eq.s32.totalorder %v1373_v47, %v1258_v4  ;;  %v524_v50 = vld [vmem:[#allocation2 + $0x28] sm:$0xff] }
  0xe0   :  { %513 = vmax.xlane.f32.xlu1 %v1565_v38 }
  0xe1   :  { %v186_v54 = vmul.f32 2.0, %v170_v52 }
  0xe2   :  { %v155_v21 = vpop.trf.xlu0 }
  0xe3   :  { %v171_v23 = vmul.f32 %v155_v21, %v107_v40  ;;  %v1575_v41 = vsel %vm452_vm15, -inf, %v186_v54  ;;  %v1580_v55 = vsel %vm1789_vm0, %v186_v54, 0.0 }
  0xe4   :  { %515 = vmax.xlane.f32.xlu1 %v1575_v41 }
  0xe5   :  { %v187_v43 = vmul.f32 2.0, %v171_v23 }
  0xe7   :  { %v1585_v60 = vsel %vm453_vm13, -inf, %v187_v43  ;;  %v1590_v44 = vsel %vm1790_vm1, %v187_v43, 0.0  ;;  %v525_v43 = vld [vmem:[#allocation2 + $0x30] sm:$0xff] }
  0xe8   :  { %517 = vmax.xlane.f32.xlu1 %v1585_v60 }
 0x139   :  { %v488_v62 = vpop.xlane.xlu1 %487 }
 0x13a   :  { %v535_v46 = vmax.f32 %v519_v61, %v488_v62 }
 0x13c   :  { %v567_v26 = vsub.f32 %v519_v61, %v535_v46  ;;  %856 = vst.msk [vmem:[#allocation2] sm:$0xff] %vm43_vm12, %v535_v46  ;;  %665 = vperm.xlu0 %1064, %v535_v46   ;;  %vm551_vm2 = vcmp.eq.f32.partialorder %v535_v46, -inf }
 0x13d   :  { %v490_v3 = vpop.xlane.xlu1 %489 }
 0x13e   :  { %v583_v47 = vmul.f32 1.442695, %v567_v26  ;;  %v536_v7 = vmax.f32 %v520_v1, %v490_v3 }
 0x140   :  { %1066 = vpow2.f32 %v583_v47  ;;  %v568_v28 = vsub.f32 %v520_v1, %v536_v7  ;;  %857 = vst.msk [vmem:[#allocation2 + $0x8] sm:$0xff] %vm43_vm12, %v536_v7  ;;  %670 = vperm.xlu1 %1065, %v536_v7   ;;  %vm552_vm3 = vcmp.eq.f32.partialorder %v536_v7, -inf  ;;  %v526_v47 = vld [vmem:[#allocation2 + $0x38] sm:$0xff] }
 0x141   :  { %v492_v4 = vpop.xlane.xlu1 %491 }
 0x142   :  { %v585_v48 = vmul.f32 1.442695, %v568_v28  ;;  %v537_v16 = vmax.f32 %v521_v8, %v492_v4 }
 0x144   :  { %1068 = vpow2.f32 %v585_v48  ;;  %v569_v11 = vsub.f32 %v521_v8, %v537_v16  ;;  %858 = vst.msk [vmem:[#allocation2 + $0x10] sm:$0xff] %vm43_vm12, %v537_v16  ;;  %675 = vperm.xlu1 %1065, %v537_v16   ;;  %vm553_vm4 = vcmp.eq.f32.partialorder %v537_v16, -inf }
 0x145   :  { %v494_v31 = vpop.xlane.xlu1 %493 }
 0x146   :  { %v587_v27 = vmul.f32 1.442695, %v569_v11  ;;  %v538_v30 = vmax.f32 %v522_v19, %v494_v31  ;;  %v527_v11 = vld [vmem:[#allocation2 + $0x40] sm:$0xff] }
 0x148   :  { %1070 = vpow2.f32 %v587_v27  ;;  %v570_v34 = vsub.f32 %v522_v19, %v538_v30  ;;  %859 = vst.msk [vmem:[#allocation2 + $0x18] sm:$0xff] %vm43_vm12, %v538_v30  ;;  %680 = vperm.xlu1 %1065, %v538_v30   ;;  %vm554_vm5 = vcmp.eq.f32.partialorder %v538_v30, -inf }
 0x149   :  { %v496_v15 = vpop.xlane.xlu1 %495 }
 0x14a   :  { %v1067_v39 = vpop.eup %1066  ;;  %v589_v42 = vmul.f32 1.442695, %v570_v34  ;;  %v539_v37 = vmax.f32 %v523_v33, %v496_v15 }
 0x14b   :  { %v1597_v51 = vsel %vm551_vm2, 0.0, %v1067_v39  ;;  %v528_v39 = vld [vmem:[#allocation2 + $0x48] sm:$0xff] }
 0x14c   :  { %1072 = vpow2.f32 %v589_v42  ;;  %v571_v52 = vsub.f32 %v523_v33, %v539_v37  ;;  %860 = vst.msk [vmem:[#allocation2 + $0x20] sm:$0xff] %vm43_vm12, %v539_v37  ;;  %685 = vperm.xlu1 %1065, %v539_v37   ;;  %vm555_vm6 = vcmp.eq.f32.partialorder %v539_v37, -inf }
 0x14d   :  { %v498_v40 = vpop.xlane.xlu1 %497 }
 0x14e   :  { %v1069_v54 = vpop.eup %1068  ;;  %v591_v21 = vmul.f32 1.442695, %v571_v52  ;;  %v540_v23 = vmax.f32 %v524_v50, %v498_v40 }
 0x14f   :  { %v1600_v61 = vsel %vm552_vm3, 0.0, %v1069_v54 }
 0x150   :  { %1074 = vpow2.f32 %v591_v21  ;;  %v572_v62 = vsub.f32 %v524_v50, %v540_v23  ;;  %861 = vst.msk [vmem:[#allocation2 + $0x28] sm:$0xff] %vm43_vm12, %v540_v23  ;;  %690 = vperm.xlu1 %1065, %v540_v23   ;;  %vm556_vm7 = vcmp.eq.f32.partialorder %v540_v23, -inf  ;;  %v529_v21 = vld [vmem:[#allocation2 + $0x50] sm:$0xff] }
 0x151   :  { %v500_v46 = vpop.xlane.xlu1 %499 }
 0x152   :  { %v1071_v1 = vpop.eup %1070  ;;  %v593_v26 = vmul.f32 1.442695, %v572_v62  ;;  %v541_v3 = vmax.f32 %v525_v43, %v500_v46 }
 0x153   :  { %v1603_v8 = vsel %vm553_vm4, 0.0, %v1071_v1 }
 0x154   :  { %1076 = vpow2.f32 %v593_v26  ;;  %v573_v28 = vsub.f32 %v525_v43, %v541_v3  ;;  %862 = vst.msk [vmem:[#allocation2 + $0x30] sm:$0xff] %vm43_vm12, %v541_v3  ;;  %695 = vperm.xlu1 %1065, %v541_v3   ;;  %vm557_vm8 = vcmp.eq.f32.partialorder %v541_v3, -inf }
 0x155   :  { %v502_v7 = vpop.xlane.xlu1 %501 }
 0x156   :  { %v1073_v4 = vpop.eup %1072  ;;  %v595_v48 = vmul.f32 1.442695, %v573_v28  ;;  %v542_v19 = vmax.f32 %v526_v47, %v502_v7 }
 0x157   :  { %v1606_v31 = vsel %vm554_vm5, 0.0, %v1073_v4 }
 0x158   :  { %1078 = vpow2.f32 %v595_v48  ;;  %v574_v27 = vsub.f32 %v526_v47, %v542_v19  ;;  %863 = vst.msk [vmem:[#allocation2 + $0x38] sm:$0xff] %vm43_vm12, %v542_v19  ;;  %700 = vperm.xlu1 %1065, %v542_v19   ;;  %v530_v47 = vld [vmem:[#allocation2 + $0x58] sm:$0xff]  ;;  %vm558_vm9 = vcmp.eq.f32.partialorder %v542_v19, -inf }
 0x159   :  { %v504_v16 = vpop.xlane.xlu1 %503 }
 0x15a   :  { %v1075_v33 = vpop.eup %1074  ;;  %v597_v34 = vmul.f32 1.442695, %v574_v27  ;;  %v543_v15 = vmax.f32 %v527_v11, %v504_v16  ;;  %v531_v27 = vld [vmem:[#allocation2 + $0x60] sm:$0xff] }
 0x15b   :  { %v1609_v42 = vsel %vm555_vm6, 0.0, %v1075_v33 }
 0x15c   :  { %1080 = vpow2.f32 %v597_v34  ;;  %v575_v50 = vsub.f32 %v527_v11, %v543_v15  ;;  %864 = vst.msk [vmem:[#allocation2 + $0x40] sm:$0xff] %vm43_vm12, %v543_v15  ;;  %705 = vperm.xlu0 %1064, %v543_v15   ;;  %vm559_vm10 = vcmp.eq.f32.partialorder %v543_v15, -inf }
 0x15d   :  { %v506_v30 = vpop.xlane.xlu1 %505 }
 0x15e   :  { %v1077_v52 = vpop.eup %1076  ;;  %v599_v40 = vmul.f32 1.442695, %v575_v50  ;;  %v544_v54 = vmax.f32 %v528_v39, %v506_v30  ;;  %v532_v30 = vld [vmem:[#allocation2 + $0x68] sm:$0xff] }
 0x15f   :  { %v1612_v43 = vsel %vm556_vm7, 0.0, %v1077_v52 }
 0x160   :  { %1082 = vpow2.f32 %v599_v40  ;;  %v576_v62 = vsub.f32 %v528_v39, %v544_v54  ;;  %865 = vst.msk [vmem:[#allocation2 + $0x48] sm:$0xff] %vm43_vm12, %v544_v54  ;;  %710 = vperm.xlu1 %1065, %v544_v54   ;;  %vm560_vm14 = vcmp.eq.f32.partialorder %v544_v54, -inf }
 0x161   :  { %v508_v37 = vpop.xlane.xlu1 %507 }
 0x162   :  { %v1079_v46 = vpop.eup %1078  ;;  %v601_v1 = vmul.f32 1.442695, %v576_v62  ;;  %v545_v26 = vmax.f32 %v529_v21, %v508_v37 }
 0x163   :  { %v1615_v28 = vsel %vm557_vm8, 0.0, %v1079_v46  ;;  %v533_v46 = vld [vmem:[#allocation2 + $0x70] sm:$0xff] }
 0x164   :  { %1084 = vpow2.f32 %v601_v1  ;;  %v577_v7 = vsub.f32 %v529_v21, %v545_v26  ;;  %866 = vst.msk [vmem:[#allocation2 + $0x50] sm:$0xff] %vm43_vm12, %v545_v26  ;;  %715 = vperm.xlu0 %1064, %v545_v26   ;;  %vm561_vm11 = vcmp.eq.f32.partialorder %v545_v26, -inf }
 0x165   :  { %v510_v23 = vpop.xlane.xlu1 %509 }
 0x166   :  { %v1081_v4 = vpop.eup %1080  ;;  %v603_v48 = vmul.f32 1.442695, %v577_v7  ;;  %v546_v11 = vmax.f32 %v530_v47, %v510_v23 }
 0x167   :  { %v1618_v16 = vsel %vm558_vm9, 0.0, %v1081_v4 }
 0x168   :  { %1086 = vpow2.f32 %v603_v48  ;;  %v578_v33 = vsub.f32 %v530_v47, %v546_v11  ;;  %867 = vst.msk [vmem:[#allocation2 + $0x58] sm:$0xff] %vm43_vm12, %v546_v11  ;;  %720 = vperm.xlu1 %1065, %v546_v11   ;;  %v534_v48 = vld [vmem:[#allocation2 + $0x78] sm:$0xff]  ;;  %vm562_vm15 = vcmp.eq.f32.partialorder %v546_v11, -inf }
 0x169   :  { %v512_v3 = vpop.xlane.xlu1 %511 }
 0x16a   :  { %v1083_v34 = vpop.eup %1082  ;;  %v605_v39 = vmul.f32 1.442695, %v578_v33  ;;  %v547_v50 = vmax.f32 %v531_v27, %v512_v3 }
 0x16b   :  { %v1621_v52 = vsel %vm559_vm10, 0.0, %v1083_v34 }
 0x16c   :  { %1088 = vpow2.f32 %v605_v39  ;;  %v579_v40 = vsub.f32 %v531_v27, %v547_v50  ;;  %868 = vst.msk [vmem:[#allocation2 + $0x60] sm:$0xff] %vm43_vm12, %v547_v50  ;;  %725 = vperm.xlu0 %1064, %v547_v50   ;;  %vm563_vm0 = vcmp.eq.f32.partialorder %v547_v50, -inf }
 0x16d   :  { %v514_v19 = vpop.xlane.xlu1 %513 }
 0x16e   :  { %v1085_v21 = vpop.eup %1084  ;;  %v607_v62 = vmul.f32 1.442695, %v579_v40  ;;  %v548_v37 = vmax.f32 %v532_v30, %v514_v19 }
 0x16f   :  { %v1624_v1 = vsel %vm560_vm14, 0.0, %v1085_v21 }
 0x170   :  { %1090 = vpow2.f32 %v607_v62  ;;  %v580_v47 = vsub.f32 %v532_v30, %v548_v37  ;;  %869 = vst.msk [vmem:[#allocation2 + $0x68] sm:$0xff] %vm43_vm12, %v548_v37  ;;  %730 = vperm.xlu1 %1065, %v548_v37   ;;  %vm564_vm13 = vcmp.eq.f32.partialorder %v548_v37, -inf }
 0x171   :  { %v516_v15 = vpop.xlane.xlu1 %515 }
 0x172   :  { %v1087_v7 = vpop.eup %1086  ;;  %v609_v23 = vmul.f32 1.442695, %v580_v47  ;;  %v549_v4 = vmax.f32 %v533_v46, %v516_v15 }
 0x173   :  { %v1627_v27 = vsel %vm561_vm11, 0.0, %v1087_v7 }
 0x174   :  { %1092 = vpow2.f32 %v609_v23  ;;  %v581_v33 = vsub.f32 %v533_v46, %v549_v4  ;;  %870 = vst.msk [vmem:[#allocation2 + $0x70] sm:$0xff] %vm43_vm12, %v549_v4  ;;  %735 = vperm.xlu0 %1064, %v549_v4   ;;  %vm565_vm1 = vcmp.eq.f32.partialorder %v549_v4, -inf }
 0x175   :  { %v518_v54 = vpop.xlane.xlu1 %517 }
 0x176   :  { %v1089_v3 = vpop.eup %1088  ;;  %v611_v34 = vmul.f32 1.442695, %v581_v33  ;;  %v550_v39 = vmax.f32 %v534_v48, %v518_v54 }
 0x177   :  { %v1630_v30 = vsel %vm562_vm15, 0.0, %v1089_v3 }
 0x178   :  { %1094 = vpow2.f32 %v611_v34  ;;  %v582_v40 = vsub.f32 %v534_v48, %v550_v39  ;;  %871 = vst.msk [vmem:[#allocation2 + $0x78] sm:$0xff] %vm43_vm12, %v550_v39  ;;  %740 = vperm.xlu1 %1065, %v550_v39   ;;  %vm566_vm2 = vcmp.eq.f32.partialorder %v550_v39, -inf }
 0x17a   :  { %v1091_v26 = vpop.eup %1090  ;;  %v613_v19 = vmul.f32 1.442695, %v582_v40 }
 0x17b   :  { %v1633_v21 = vsel %vm563_vm0, 0.0, %v1091_v26 }
 0x17c   :  { %1096 = vpow2.f32 %v613_v19 }
 0x17e   :  { %v1093_v62 = vpop.eup %1092 }
 0x17f   :  { %v1635_v46 = vsel %vm564_vm13, 0.0, %v1093_v62 }
 0x182   :  { %v1095_v47 = vpop.eup %1094 }
 0x183   :  { %v1637_v11 = vsel %vm565_vm1, 0.0, %v1095_v47 }
 0x186   :  { %v1097_v15 = vpop.eup %1096 }
 0x187   :  { %v1639_v7 = vsel %vm566_vm2, 0.0, %v1097_v15 }
 0x193   :  { %375 = vadd.xlane.f32.xlu0 %v1415_v0 }
 0x197   :  { %379 = vadd.xlane.f32.xlu0 %v1435_v22 }
 0x19b   :  { %383 = vadd.xlane.f32.xlu0 %v1455_v49 }
 0x19c   :  { %373 = vadd.xlane.f32.xlu1 %v1405_v58 }
 0x19f   :  { %387 = vadd.xlane.f32.xlu0 %v1510_v59 }
 0x1a0   :  { %377 = vadd.xlane.f32.xlu1 %v1425_v10 }
 0x1a4   :  { %381 = vadd.xlane.f32.xlu1 %v1445_v14 }
 0x1a8   :  { %385 = vadd.xlane.f32.xlu1 %v1465_v53 }
 0x1bb   :  { %v666_v50 = vpop.permute.xlu0 %665 }
 0x1bc   :  { %v743_v37 = vsub.f32 %v1400_v57, %v666_v50 }
 0x1be   :  { %v759_v23 = vmul.f32 1.442695, %v743_v37 }
 0x1bf   :  { %v671_v4 = vpop.permute.xlu1 %670 }
 0x1c0   :  { %1098 = vpow2.f32 %v759_v23  ;;  %v744_v0 = vsub.f32 %v1410_v63, %v671_v4 }
 0x1c2   :  { %v761_v22 = vmul.f32 1.442695, %v744_v0 }
 0x1c3   :  { %v676_v49 = vpop.permute.xlu1 %675 }
 0x1c4   :  { %1100 = vpow2.f32 %v761_v22  ;;  %v745_v58 = vsub.f32 %v1420_v6, %v676_v49 }
 0x1c6   :  { %v763_v59 = vmul.f32 1.442695, %v745_v58 }
 0x1c7   :  { %v681_v48 = vpop.permute.xlu1 %680 }
 0x1c8   :  { %1102 = vpow2.f32 %v763_v59  ;;  %v746_v10 = vsub.f32 %v1430_v9, %v681_v48 }
 0x1ca   :  { %v1099_v14 = vpop.eup %1098  ;;  %v765_v53 = vmul.f32 1.442695, %v746_v10 }
 0x1cb   :  { %v686_v33 = vpop.permute.xlu1 %685  ;;  %791 = vadd.xlane.f32.xlu0 %v1099_v14 }
 0x1cc   :  { %1104 = vpow2.f32 %v765_v53  ;;  %v747_v57 = vsub.f32 %v1440_v12, %v686_v33 }
 0x1ce   :  { %v1101_v54 = vpop.eup %1100  ;;  %v767_v3 = vmul.f32 1.442695, %v747_v57 }
 0x1cf   :  { %793 = vadd.xlane.f32.xlu1 %v1101_v54  ;;  %v691_v63 = vpop.permute.xlu1 %690 }
 0x1d0   :  { %1106 = vpow2.f32 %v767_v3  ;;  %v748_v34 = vsub.f32 %v1450_v45, %v691_v63 }
 0x1d2   :  { %v1103_v6 = vpop.eup %1102  ;;  %v769_v39 = vmul.f32 1.442695, %v748_v34 }
 0x1d3   :  { %v696_v40 = vpop.permute.xlu1 %695  ;;  %795 = vadd.xlane.f32.xlu0 %v1103_v6 }
 0x1d4   :  { %1108 = vpow2.f32 %v769_v39  ;;  %v749_v9 = vsub.f32 %v1460_v18, %v696_v40 }
 0x1d6   :  { %v1105_v26 = vpop.eup %1104  ;;  %v771_v19 = vmul.f32 1.442695, %v749_v9 }
 0x1d7   :  { %v701_v62 = vpop.permute.xlu1 %700  ;;  %797 = vadd.xlane.f32.xlu0 %v1105_v26 }
 0x1d8   :  { %1110 = vpow2.f32 %v771_v19  ;;  %v750_v12 = vsub.f32 %v1505_v56, %v701_v62 }
 0x1da   :  { %v1107_v47 = vpop.eup %1106  ;;  %v773_v15 = vmul.f32 1.442695, %v750_v12 }
 0x1db   :  { %799 = vadd.xlane.f32.xlu1 %v1107_v47  ;;  %v706_v50 = vpop.permute.xlu0 %705  ;;  %v344_v47 = vld [vmem:[#allocation4 + $0x18] sm:$0xff] }
 0x1dc   :  { %1112 = vpow2.f32 %v773_v15  ;;  %v751_v45 = vsub.f32 %v1515_v2, %v706_v50  ;;  %v346_v15 = vld [vmem:[#allocation4 + $0x28] sm:$0xff] }
 0x1de   :  { %v1109_v37 = vpop.eup %1108  ;;  %v775_v23 = vmul.f32 1.442695, %v751_v45  ;;  %v348_v45 = vld [vmem:[#allocation4 + $0x38] sm:$0xff] }
 0x1df   :  { %v711_v4 = vpop.permute.xlu1 %710  ;;  %801 = vadd.xlane.f32.xlu0 %v1109_v37 }
 0x1e0   :  { %1114 = vpow2.f32 %v775_v23  ;;  %v752_v18 = vsub.f32 %v1525_v5, %v711_v4 }
 0x1e2   :  { %v1111_v0 = vpop.eup %1110  ;;  %v777_v22 = vmul.f32 1.442695, %v752_v18  ;;  %v345_v18 = vld [vmem:[#allocation4 + $0x20] sm:$0xff] }
 0x1e3   :  { %803 = vadd.xlane.f32.xlu1 %v1111_v0  ;;  %v716_v49 = vpop.permute.xlu0 %715 }
 0x1e4   :  { %1116 = vpow2.f32 %v777_v22  ;;  %v753_v56 = vsub.f32 %v1535_v29, %v716_v49  ;;  %v347_v49 = vld [vmem:[#allocation4 + $0x30] sm:$0xff] }
 0x1e6   :  { %v1113_v58 = vpop.eup %1112  ;;  %v779_v59 = vmul.f32 1.442695, %v753_v56 }
 0x1e7   :  { %v721_v48 = vpop.permute.xlu1 %720  ;;  %805 = vadd.xlane.f32.xlu0 %v1113_v58 }
 0x1e8   :  { %1118 = vpow2.f32 %v779_v59  ;;  %v754_v2 = vsub.f32 %v1545_v32, %v721_v48  ;;  %v631_v59 = vld [vmem:[#allocation3] sm:$0xff] }
 0x1e9   :  { %v647_v48 = vmul.f32 %v631_v59, %v1597_v51 }
 0x1ea   :  { %v1115_v10 = vpop.eup %1114  ;;  %v781_v14 = vmul.f32 1.442695, %v754_v2 }
 0x1eb   :  { %807 = vadd.xlane.f32.xlu1 %v1115_v10  ;;  %v726_v53 = vpop.permute.xlu0 %725  ;;  %v632_v10 = vld [vmem:[#allocation3 + $0x8] sm:$0xff] }
 0x1ec   :  { %1120 = vpow2.f32 %v781_v14  ;;  %v755_v5 = vsub.f32 %v1555_v35, %v726_v53  ;;  %v648_v53 = vmul.f32 %v632_v10, %v1600_v61 }
 0x1ee   :  { %v1117_v33 = vpop.eup %1116  ;;  %v783_v57 = vmul.f32 1.442695, %v755_v5 }
 0x1ef   :  { %v731_v54 = vpop.permute.xlu1 %730  ;;  %809 = vadd.xlane.f32.xlu0 %v1117_v33  ;;  %v633_v33 = vld [vmem:[#allocation3 + $0x10] sm:$0xff] }
 0x1f0   :  { %1122 = vpow2.f32 %v783_v57  ;;  %v756_v29 = vsub.f32 %v1565_v38, %v731_v54  ;;  %v649_v54 = vmul.f32 %v633_v33, %v1603_v8  ;;  %v636_v8 = vld [vmem:[#allocation3 + $0x28] sm:$0xff] }
 0x1f2   :  { %v1119_v3 = vpop.eup %1118  ;;  %v785_v63 = vmul.f32 1.442695, %v756_v29 }
 0x1f3   :  { %811 = vadd.xlane.f32.xlu1 %v1119_v3  ;;  %v736_v34 = vpop.permute.xlu0 %735  ;;  %v634_v3 = vld [vmem:[#allocation3 + $0x18] sm:$0xff] }
 0x1f4   :  { %1124 = vpow2.f32 %v785_v63  ;;  %v757_v32 = vsub.f32 %v1575_v41, %v736_v34  ;;  %v342_v41 = vld [vmem:[#allocation4 + $0x8] sm:$0xff]  ;;  %v650_v51 = vmul.f32 %v634_v3, %v1606_v31  ;;  %v637_v31 = vld [vmem:[#allocation3 + $0x30] sm:$0xff] }
 0x1f5   :  { %v641_v3 = vld [vmem:[#allocation3 + $0x50] sm:$0xff] }
 0x1f6   :  { %v1121_v6 = vpop.eup %1120  ;;  %v787_v39 = vmul.f32 1.442695, %v757_v32 }
 0x1f7   :  { %v741_v40 = vpop.permute.xlu1 %740  ;;  %813 = vadd.xlane.f32.xlu0 %v1121_v6  ;;  %v635_v6 = vld [vmem:[#allocation3 + $0x20] sm:$0xff] }
 0x1f8   :  { %1126 = vpow2.f32 %v787_v39  ;;  %v758_v35 = vsub.f32 %v1585_v60, %v741_v40  ;;  %v651_v40 = vmul.f32 %v635_v6, %v1609_v42  ;;  %v653_v42 = vmul.f32 %v637_v31, %v1615_v28 }
 0x1fa   :  { %v1123_v9 = vpop.eup %1122  ;;  %v789_v26 = vmul.f32 1.442695, %v758_v35 }
 0x1fb   :  { %815 = vadd.xlane.f32.xlu1 %v1123_v9 }
 0x1fc   :  { %1128 = vpow2.f32 %v789_v26 }
 0x1fe   :  { %v1125_v19 = vpop.eup %1124 }
 0x1ff   :  { %817 = vadd.xlane.f32.xlu0 %v1125_v19  ;;  %v652_v19 = vmul.f32 %v636_v8, %v1612_v43  ;;  %v642_v8 = vld [vmem:[#allocation3 + $0x58] sm:$0xff] }
 0x202   :  { %v1127_v38 = vpop.eup %1126 }
 0x203   :  { %819 = vadd.xlane.f32.xlu1 %v1127_v38 }
 0x206   :  { %v1129_v62 = vpop.eup %1128 }
 0x207   :  { %821 = vadd.xlane.f32.xlu0 %v1129_v62  ;;  %389 = vadd.xlane.f32.xlu1 %v1520_v24 }
 0x20b   :  { %391 = vadd.xlane.f32.xlu0 %v1530_v13  ;;  %393 = vadd.xlane.f32.xlu1 %v1540_v25  ;;  %v341_v25 = vld [vmem:[#allocation4] sm:$0xff] }
 0x20f   :  { %395 = vadd.xlane.f32.xlu0 %v1550_v36  ;;  %397 = vadd.xlane.f32.xlu1 %v1560_v17 }
 0x213   :  { %399 = vadd.xlane.f32.xlu0 %v1570_v20  ;;  %401 = vadd.xlane.f32.xlu1 %v1580_v55  ;;  %v343_v55 = vld [vmem:[#allocation4 + $0x10] sm:$0xff] }
 0x217   :  { %403 = vadd.xlane.f32.xlu0 %v1590_v44 }
 0x220   :  { %v376_v60 = vpop.xlane.xlu0 %375 }
 0x221   :  { %v406_v12 = vadd.f32 %v376_v60, %v342_v41 }
 0x223   :  { %423 = vst.msk [vmem:[#allocation4 + $0x8] sm:$0xff] %vm43_vm12, %v406_v12 }
 0x224   :  { %v380_v24 = vpop.xlane.xlu0 %379 }
 0x225   :  { %v408_v13 = vadd.f32 %v380_v24, %v344_v47  ;;  %v875_v47 = vld [vmem:[#allocation2] sm:$0xff] }
 0x227   :  { %425 = vst.msk [vmem:[#allocation4 + $0x18] sm:$0xff] %vm43_vm12, %v408_v13 }
 0x228   :  { %v384_v36 = vpop.xlane.xlu0 %383 }
 0x229   :  { %v410_v17 = vadd.f32 %v384_v36, %v346_v15  ;;  %v374_v50 = vpop.xlane.xlu1 %373  ;;  %v638_v15 = vld [vmem:[#allocation3 + $0x38] sm:$0xff] }
 0x22a   :  { %v405_v20 = vadd.f32 %v374_v50, %v341_v25 }
 0x22b   :  { %427 = vst.msk [vmem:[#allocation4 + $0x28] sm:$0xff] %vm43_vm12, %v410_v17 }
 0x22c   :  { %422 = vst.msk [vmem:[#allocation4] sm:$0xff] %vm43_vm12, %v405_v20  ;;  %v388_v44 = vpop.xlane.xlu0 %387 }
 0x22d   :  { %v412_v37 = vadd.f32 %v388_v44, %v348_v45  ;;  %v378_v23 = vpop.xlane.xlu1 %377  ;;  %v876_v45 = vld [vmem:[#allocation2 + $0x8] sm:$0xff] }
 0x22e   :  { %v407_v4 = vadd.f32 %v378_v23, %v343_v55  ;;  %v654_v55 = vmul.f32 %v638_v15, %v1618_v16 }
 0x22f   :  { %429 = vst.msk [vmem:[#allocation4 + $0x38] sm:$0xff] %vm43_vm12, %v412_v37  ;;  %v639_v37 = vld [vmem:[#allocation3 + $0x40] sm:$0xff] }
 0x230   :  { %424 = vst.msk [vmem:[#allocation4 + $0x10] sm:$0xff] %vm43_vm12, %v407_v4  ;;  %v972_v4 = vld [vmem:[#allocation4 + $0x8] sm:$0xff]  ;;  %v655_v16 = vmul.f32 %v639_v37, %v1621_v52  ;;  %v882_v37 = vld [vmem:[#allocation2 + $0x38] sm:$0xff] }
 0x231   :  { %v382_v0 = vpop.xlane.xlu1 %381 }
 0x232   :  { %v409_v22 = vadd.f32 %v382_v0, %v345_v18 }
 0x233   :  { %v971_v36 = vld [vmem:[#allocation4] sm:$0xff] }
 0x234   :  { %426 = vst.msk [vmem:[#allocation4 + $0x20] sm:$0xff] %vm43_vm12, %v409_v22 }
 0x235   :  { %v386_v56 = vpop.xlane.xlu1 %385 }
 0x236   :  { %v411_v58 = vadd.f32 %v386_v56, %v347_v49  ;;  %v877_v56 = vld [vmem:[#allocation2 + $0x10] sm:$0xff] }
 0x237   :  { %v973_v10 = vld [vmem:[#allocation4 + $0x10] sm:$0xff] }
 0x238   :  { %428 = vst.msk [vmem:[#allocation4 + $0x30] sm:$0xff] %vm43_vm12, %v411_v58 }
 0x258   :  { %v792_v2 = vpop.xlane.xlu0 %791 }
 0x259   :  { %v823_v14 = vadd.f32 %v792_v2, %v647_v48  ;;  %v640_v48 = vld [vmem:[#allocation3 + $0x48] sm:$0xff] }
 0x25a   :  { %v656_v52 = vmul.f32 %v640_v48, %v1624_v1  ;;  %v657_v1 = vmul.f32 %v641_v3, %v1627_v27  ;;  %v646_v48 = vld [vmem:[#allocation3 + $0x78] sm:$0xff]  ;;  %v350_v3 = vld [vmem:[#allocation4 + $0x48] sm:$0xff] }
 0x25b   :  { %840 = vst.msk [vmem:[#allocation3] sm:$0xff] %vm43_vm12, %v823_v14 }
 0x25c   :  { %v794_v5 = vpop.xlane.xlu1 %793 }
 0x25d   :  { %v824_v57 = vadd.f32 %v794_v5, %v648_v53 }
 0x25f   :  { %841 = vst.msk [vmem:[#allocation3 + $0x8] sm:$0xff] %vm43_vm12, %v824_v57  ;;  %v878_v57 = vld [vmem:[#allocation2 + $0x18] sm:$0xff] }
 0x260   :  { %v796_v29 = vpop.xlane.xlu0 %795 }
 0x261   :  { %v825_v63 = vadd.f32 %v796_v29, %v649_v54 }
 0x262   :  { %v891_v34 = vld [vmem:[#allocation3] sm:$0xff] }
 0x263   :  { %1130 = vlog2.f32 %v891_v34  ;;  %842 = vst.msk [vmem:[#allocation3 + $0x10] sm:$0xff] %vm43_vm12, %v825_v63  ;;  %v974_v34 = vld [vmem:[#allocation4 + $0x18] sm:$0xff] }
 0x264   :  { %v798_v32 = vpop.xlane.xlu0 %797 }
 0x265   :  { %v826_v39 = vadd.f32 %v798_v32, %v650_v51 }
 0x266   :  { %v892_v61 = vld [vmem:[#allocation3 + $0x8] sm:$0xff] }
 0x267   :  { %1132 = vlog2.f32 %v892_v61  ;;  %843 = vst.msk [vmem:[#allocation3 + $0x18] sm:$0xff] %vm43_vm12, %v826_v39  ;;  %v879_v61 = vld [vmem:[#allocation2 + $0x20] sm:$0xff] }
 0x268   :  { %v800_v35 = vpop.xlane.xlu1 %799 }
 0x269   :  { %v827_v9 = vadd.f32 %v800_v35, %v651_v40 }
 0x26a   :  { %v893_v26 = vld [vmem:[#allocation3 + $0x10] sm:$0xff] }
 0x26b   :  { %1134 = vlog2.f32 %v893_v26  ;;  %844 = vst.msk [vmem:[#allocation3 + $0x20] sm:$0xff] %vm43_vm12, %v827_v9  ;;  %v975_v26 = vld [vmem:[#allocation4 + $0x20] sm:$0xff] }
 0x26c   :  { %v802_v38 = vpop.xlane.xlu0 %801 }
 0x26d   :  { %v1131_v62 = vpop.eup %1130  ;;  %v828_v41 = vadd.f32 %v802_v38, %v652_v19 }
 0x26e   :  { %v908_v60 = vmul.f32 0.6931472, %v1131_v62  ;;  %v894_v12 = vld [vmem:[#allocation3 + $0x18] sm:$0xff]  ;;  %v880_v62 = vld [vmem:[#allocation2 + $0x28] sm:$0xff] }
 0x26f   :  { %1136 = vlog2.f32 %v894_v12  ;;  %845 = vst.msk [vmem:[#allocation3 + $0x28] sm:$0xff] %vm43_vm12, %v828_v41  ;;  %v658_v41 = vmul.f32 %v642_v8, %v1630_v30  ;;  %v643_v12 = vld [vmem:[#allocation3 + $0x60] sm:$0xff] }
 0x270   :  { %v939_v24 = vadd.f32 %v908_v60, %v875_v47  ;;  %v804_v13 = vpop.xlane.xlu1 %803 }
 0x271   :  { %v1133_v25 = vpop.eup %1132  ;;  %v829_v17 = vadd.f32 %v804_v13, %v653_v42  ;;  %v976_v42 = vld [vmem:[#allocation4 + $0x28] sm:$0xff] }
 0x272   :  { %v987_v50 = vsub.f32 %v939_v24, %v971_v36  ;;  %v910_v43 = vmul.f32 0.6931472, %v1133_v25  ;;  %v895_v20 = vld [vmem:[#allocation3 + $0x20] sm:$0xff]  ;;  %v881_v25 = vld [vmem:[#allocation2 + $0x30] sm:$0xff]  ;;  %v659_v36 = vmul.f32 %v643_v12, %v1633_v21 }
 0x273   :  { %1138 = vlog2.f32 %v895_v20  ;;  %846 = vst.msk [vmem:[#allocation3 + $0x30] sm:$0xff] %vm43_vm12, %v829_v17  ;;  %v977_v20 = vld [vmem:[#allocation4 + $0x30] sm:$0xff] }
 0x274   :  { %1019 = vst.msk [vmem:[%s1787_s2] sm:$0xff] %vm43_vm12, %v987_v50  ;;  %v940_v28 = vadd.f32 %v910_v43, %v876_v45  ;;  %v806_v44 = vpop.xlane.xlu0 %805  ;;  %v644_v50 = vld [vmem:[#allocation3 + $0x68] sm:$0xff] }
 0x275   :  { %v1135_v23 = vpop.eup %1134  ;;  %v830_v18 = vadd.f32 %v806_v44, %v654_v55  ;;  %v660_v21 = vmul.f32 %v644_v50, %v1635_v46 }
 0x276   :  { %v988_v0 = vsub.f32 %v940_v28, %v972_v4  ;;  %v912_v22 = vmul.f32 0.6931472, %v1135_v23  ;;  %v896_v49 = vld [vmem:[#allocation3 + $0x28] sm:$0xff] }
 0x277   :  { %1140 = vlog2.f32 %v896_v49  ;;  %847 = vst.msk [vmem:[#allocation3 + $0x38] sm:$0xff] %vm43_vm12, %v830_v18  ;;  %v978_v49 = vld [vmem:[#allocation4 + $0x38] sm:$0xff] }
 0x278   :  { %1020 = vst.msk [vmem:[%s1787_s2 + $0x8] sm:$0xff] %vm43_vm12, %v988_v0  ;;  %v941_v58 = vadd.f32 %v912_v22, %v877_v56  ;;  %v808_v59 = vpop.xlane.xlu1 %807  ;;  %v645_v22 = vld [vmem:[#allocation3 + $0x70] sm:$0xff] }
 0x279   :  { %v1137_v2 = vpop.eup %1136  ;;  %v831_v14 = vadd.f32 %v808_v59, %v655_v16 }
 0x27a   :  { %v989_v53 = vsub.f32 %v941_v58, %v973_v10  ;;  %v914_v5 = vmul.f32 0.6931472, %v1137_v2  ;;  %v897_v33 = vld [vmem:[#allocation3 + $0x30] sm:$0xff]  ;;  %v661_v58 = vmul.f32 %v645_v22, %v1637_v11 }
 0x27b   :  { %1142 = vlog2.f32 %v897_v33  ;;  %848 = vst.msk [vmem:[#allocation3 + $0x40] sm:$0xff] %vm43_vm12, %v831_v14  ;;  %v349_v14 = vld [vmem:[#allocation4 + $0x40] sm:$0xff] }
 0x27c   :  { %1021 = vst.msk [vmem:[%s1787_s2 + $0x10] sm:$0xff] %vm43_vm12, %v989_v53  ;;  %v942_v54 = vadd.f32 %v914_v5, %v878_v57  ;;  %v810_v29 = vpop.xlane.xlu0 %809  ;;  %v662_v53 = vmul.f32 %v646_v48, %v1639_v7 }
 0x27d   :  { %v1139_v63 = vpop.eup %1138  ;;  %v832_v51 = vadd.f32 %v810_v29, %v656_v52  ;;  %v351_v29 = vld [vmem:[#allocation4 + $0x50] sm:$0xff] }
 0x27e   :  { %v990_v32 = vsub.f32 %v942_v54, %v974_v34  ;;  %v916_v6 = vmul.f32 0.6931472, %v1139_v63  ;;  %v898_v39 = vld [vmem:[#allocation3 + $0x38] sm:$0xff] }
 0x27f   :  { %1144 = vlog2.f32 %v898_v39  ;;  %849 = vst.msk [vmem:[#allocation3 + $0x48] sm:$0xff] %vm43_vm12, %v832_v51 }
 0x280   :  { %1022 = vst.msk [vmem:[%s1787_s2 + $0x18] sm:$0xff] %vm43_vm12, %v990_v32  ;;  %v943_v40 = vadd.f32 %v916_v6, %v879_v61  ;;  %v812_v35 = vpop.xlane.xlu1 %811 }
 0x281   :  { %v1141_v9 = vpop.eup %1140  ;;  %v833_v19 = vadd.f32 %v812_v35, %v657_v1  ;;  %v353_v1 = vld [vmem:[#allocation4 + $0x60] sm:$0xff] }
 0x282   :  { %v991_v38 = vsub.f32 %v943_v40, %v975_v26  ;;  %v918_v31 = vmul.f32 0.6931472, %v1141_v9  ;;  %v899_v45 = vld [vmem:[#allocation3 + $0x40] sm:$0xff]  ;;  %v352_v40 = vld [vmem:[#allocation4 + $0x58] sm:$0xff] }
 0x283   :  { %850 = vst.msk [vmem:[#allocation3 + $0x50] sm:$0xff] %vm43_vm12, %v833_v19  ;;  %1146 = vlog2.f32 %v899_v45  ;;  %v883_v35 = vld [vmem:[#allocation2 + $0x40] sm:$0xff] }
 0x284   :  { %1023 = vst.msk [vmem:[%s1787_s2 + $0x20] sm:$0xff] %vm43_vm12, %v991_v38  ;;  %v944_v27 = vadd.f32 %v918_v31, %v880_v62  ;;  %v814_v60 = vpop.xlane.xlu0 %813 }
 0x285   :  { %v1143_v47 = vpop.eup %1142  ;;  %v834_v24 = vadd.f32 %v814_v60, %v658_v41 }
 0x286   :  { %v992_v13 = vsub.f32 %v944_v27, %v976_v42  ;;  %v920_v15 = vmul.f32 0.6931472, %v1143_v47  ;;  %v900_v23 = vld [vmem:[#allocation3 + $0x48] sm:$0xff]  ;;  %v355_v27 = vld [vmem:[#allocation4 + $0x70] sm:$0xff] }
 0x287   :  { %851 = vst.msk [vmem:[#allocation3 + $0x58] sm:$0xff] %vm43_vm12, %v834_v24  ;;  %1148 = vlog2.f32 %v900_v23  ;;  %v354_v42 = vld [vmem:[#allocation4 + $0x68] sm:$0xff] }
 0x288   :  { %1024 = vst.msk [vmem:[%s1787_s2 + $0x28] sm:$0xff] %vm43_vm12, %v992_v13  ;;  %v945_v30 = vadd.f32 %v920_v15, %v881_v25  ;;  %v816_v17 = vpop.xlane.xlu1 %815  ;;  %v884_v24 = vld [vmem:[#allocation2 + $0x48] sm:$0xff]  ;;  %v885_v13 = vld [vmem:[#allocation2 + $0x50] sm:$0xff] }
 0x289   :  { %v1145_v43 = vpop.eup %1144  ;;  %v835_v55 = vadd.f32 %v816_v17, %v659_v36 }
 0x28a   :  { %v993_v28 = vsub.f32 %v945_v30, %v977_v20  ;;  %v922_v44 = vmul.f32 0.6931472, %v1145_v43  ;;  %v901_v18 = vld [vmem:[#allocation3 + $0x50] sm:$0xff] }
 0x28b   :  { %852 = vst.msk [vmem:[#allocation3 + $0x60] sm:$0xff] %vm43_vm12, %v835_v55  ;;  %1150 = vlog2.f32 %v901_v18  ;;  %v887_v18 = vld [vmem:[#allocation2 + $0x60] sm:$0xff] }
 0x28c   :  { %1025 = vst.msk [vmem:[%s1787_s2 + $0x30] sm:$0xff] %vm43_vm12, %v993_v28  ;;  %v946_v4 = vadd.f32 %v922_v44, %v882_v37  ;;  %v818_v0 = vpop.xlane.xlu0 %817  ;;  %v356_v37 = vld [vmem:[#allocation4 + $0x78] sm:$0xff] }
 0x28d   :  { %v836_v56 = vadd.f32 %v818_v0, %v660_v21  ;;  %v1147_v52 = vpop.eup %1146 }
 0x28e   :  { %v994_v16 = vsub.f32 %v946_v4, %v978_v49  ;;  %v902_v46 = vld [vmem:[#allocation3 + $0x58] sm:$0xff]  ;;  %v924_v6 = vmul.f32 0.6931472, %v1147_v52 }
 0x28f   :  { %853 = vst.msk [vmem:[#allocation3 + $0x68] sm:$0xff] %vm43_vm12, %v836_v56  ;;  %1152 = vlog2.f32 %v902_v46  ;;  %v886_v4 = vld [vmem:[#allocation2 + $0x58] sm:$0xff] }
 0x290   :  { %1026 = vst.msk [vmem:[%s1787_s2 + $0x38] sm:$0xff] %vm43_vm12, %v994_v16  ;;  %v820_v59 = vpop.xlane.xlu1 %819  ;;  %v947_v31 = vadd.f32 %v924_v6, %v883_v35 }
 0x291   :  { %v837_v2 = vadd.f32 %v820_v59, %v661_v58  ;;  %v1149_v63 = vpop.eup %1148 }
 0x292   :  { %v903_v10 = vld [vmem:[#allocation3 + $0x60] sm:$0xff]  ;;  %v926_v9 = vmul.f32 0.6931472, %v1149_v63 }
 0x293   :  { %854 = vst.msk [vmem:[#allocation3 + $0x70] sm:$0xff] %vm43_vm12, %v837_v2  ;;  %1154 = vlog2.f32 %v903_v10  ;;  %v889_v2 = vld [vmem:[#allocation2 + $0x70] sm:$0xff] }
 0x294   :  { %v390_v5 = vpop.xlane.xlu1 %389  ;;  %v822_v33 = vpop.xlane.xlu0 %821  ;;  %v948_v36 = vadd.f32 %v926_v9, %v884_v24 }
 0x295   :  { %v413_v11 = vadd.f32 %v390_v5, %v349_v14  ;;  %v838_v57 = vadd.f32 %v822_v33, %v662_v53  ;;  %v1151_v32 = vpop.eup %1150  ;;  %v888_v53 = vld [vmem:[#allocation2 + $0x68] sm:$0xff] }
 0x296   :  { %v904_v54 = vld [vmem:[#allocation3 + $0x68] sm:$0xff]  ;;  %v928_v8 = vmul.f32 0.6931472, %v1151_v32 }
 0x297   :  { %430 = vst.msk [vmem:[#allocation4 + $0x40] sm:$0xff] %vm43_vm12, %v413_v11  ;;  %855 = vst.msk [vmem:[#allocation3 + $0x78] sm:$0xff] %vm43_vm12, %v838_v57  ;;  %1156 = vlog2.f32 %v904_v54 }
 0x298   :  { %v394_v34 = vpop.xlane.xlu1 %393  ;;  %v392_v51 = vpop.xlane.xlu0 %391  ;;  %v949_v25 = vadd.f32 %v928_v8, %v885_v13 }
 0x299   :  { %v415_v7 = vadd.f32 %v394_v34, %v351_v29  ;;  %v414_v39 = vadd.f32 %v392_v51, %v350_v3  ;;  %v1153_v38 = vpop.eup %1152  ;;  %v890_v29 = vld [vmem:[#allocation2 + $0x78] sm:$0xff] }
 0x29a   :  { %v905_v61 = vld [vmem:[#allocation3 + $0x70] sm:$0xff]  ;;  %v930_v43 = vmul.f32 0.6931472, %v1153_v38 }
 0x29b   :  { %1158 = vlog2.f32 %v905_v61  ;;  %432 = vst.msk [vmem:[#allocation4 + $0x50] sm:$0xff] %vm43_vm12, %v415_v7  ;;  %431 = vst.msk [vmem:[#allocation4 + $0x48] sm:$0xff] %vm43_vm12, %v414_v39 }
 0x29c   :  { %v398_v26 = vpop.xlane.xlu1 %397  ;;  %v396_v19 = vpop.xlane.xlu0 %395  ;;  %v950_v56 = vadd.f32 %v930_v43, %v886_v4 }
 0x29d   :  { %v417_v62 = vadd.f32 %v398_v26, %v353_v1  ;;  %v416_v41 = vadd.f32 %v396_v19, %v352_v40  ;;  %v1155_v60 = vpop.eup %1154 }
 0x29e   :  { %v979_v12 = vld [vmem:[#allocation4 + $0x40] sm:$0xff]  ;;  %v906_v47 = vld [vmem:[#allocation3 + $0x78] sm:$0xff]  ;;  %v932_v50 = vmul.f32 0.6931472, %v1155_v60 }
 0x29f   :  { %v995_v15 = vsub.f32 %v947_v31, %v979_v12  ;;  %1160 = vlog2.f32 %v906_v47  ;;  %434 = vst.msk [vmem:[#allocation4 + $0x60] sm:$0xff] %vm43_vm12, %v417_v62  ;;  %433 = vst.msk [vmem:[#allocation4 + $0x58] sm:$0xff] %vm43_vm12, %v416_v41 }
 0x2a0   :  { %v402_v30 = vpop.xlane.xlu1 %401  ;;  %v400_v17 = vpop.xlane.xlu0 %399  ;;  %v951_v49 = vadd.f32 %v932_v50, %v887_v18 }
 0x2a1   :  { %1027 = vst.msk [vmem:[%s1787_s2 + $0x40] sm:$0xff] %vm43_vm12, %v995_v15  ;;  %v419_v20 = vadd.f32 %v402_v30, %v355_v27  ;;  %v418_v45 = vadd.f32 %v400_v17, %v354_v42  ;;  %v1157_v55 = vpop.eup %1156 }
 0x2a2   :  { %v981_v28 = vld [vmem:[#allocation4 + $0x50] sm:$0xff]  ;;  %v980_v44 = vld [vmem:[#allocation4 + $0x48] sm:$0xff]  ;;  %v934_v16 = vmul.f32 0.6931472, %v1157_v55 }
 0x2a3   :  { %v997_v23 = vsub.f32 %v949_v25, %v981_v28  ;;  %v996_v21 = vsub.f32 %v948_v36, %v980_v44  ;;  %436 = vst.msk [vmem:[#allocation4 + $0x70] sm:$0xff] %vm43_vm12, %v419_v20  ;;  %435 = vst.msk [vmem:[#allocation4 + $0x68] sm:$0xff] %vm43_vm12, %v418_v45 }
 0x2a4   :  { %v404_v0 = vpop.xlane.xlu0 %403  ;;  %v952_v11 = vadd.f32 %v934_v16, %v888_v53 }
 0x2a5   :  { %v1159_v22 = vpop.eup %1158  ;;  %1029 = vst.msk [vmem:[%s1787_s2 + $0x50] sm:$0xff] %vm43_vm12, %v997_v23  ;;  %1028 = vst.msk [vmem:[%s1787_s2 + $0x48] sm:$0xff] %vm43_vm12, %v996_v21  ;;  %v420_v58 = vadd.f32 %v404_v0, %v356_v37 }
 0x2a6   :  { %v983_v46 = vld [vmem:[#allocation4 + $0x60] sm:$0xff]  ;;  %v982_v59 = vld [vmem:[#allocation4 + $0x58] sm:$0xff]  ;;  %v936_v48 = vmul.f32 0.6931472, %v1159_v22 }
 0x2a7   :  { %v999_v10 = vsub.f32 %v951_v49, %v983_v46  ;;  %v998_v14 = vsub.f32 %v950_v56, %v982_v59  ;;  %437 = vst.msk [vmem:[#allocation4 + $0x78] sm:$0xff] %vm43_vm12, %v420_v58 }
 0x2a8   :  { %v953_v5 = vadd.f32 %v936_v48, %v889_v2 }
 0x2a9   :  { %v1161_v33 = vpop.eup %1160  ;;  %1031 = vst.msk [vmem:[%s1787_s2 + $0x60] sm:$0xff] %vm43_vm12, %v999_v10  ;;  %1030 = vst.msk [vmem:[%s1787_s2 + $0x58] sm:$0xff] %vm43_vm12, %v998_v14 }
 0x2aa   :  { %v985_v57 = vld [vmem:[#allocation4 + $0x70] sm:$0xff]  ;;  %v984_v52 = vld [vmem:[#allocation4 + $0x68] sm:$0xff]  ;;  %v938_v54 = vmul.f32 0.6931472, %v1161_v33 }
 0x2ab   :  { %v1001_v3 = vsub.f32 %v953_v5, %v985_v57  ;;  %v1000_v63 = vsub.f32 %v952_v11, %v984_v52 }
 0x2ac   :  { %v954_v34 = vadd.f32 %v938_v54, %v890_v29 }
 0x2ad   :  { %1033 = vst.msk [vmem:[%s1787_s2 + $0x70] sm:$0xff] %vm43_vm12, %v1001_v3  ;;  %1032 = vst.msk [vmem:[%s1787_s2 + $0x68] sm:$0xff] %vm43_vm12, %v1000_v63 }
 0x2ae   :  { %v986_v51 = vld [vmem:[#allocation4 + $0x78] sm:$0xff] }
 0x2af   :  { %v1002_v32 = vsub.f32 %v954_v34, %v986_v51 }
 0x2b1   :  { %1034 = vst.msk [vmem:[%s1787_s2 + $0x78] sm:$0xff] %vm43_vm12, %v1002_v32 }
 0x2b2   :  { %1039 = vsyncpa [#allocation6], 1 }
 0x2b3   :  { %1040 = vsyncpa [#allocation8], 1 }

</bundles_post_ra>
